<compile_context>
chip_gen: v7x
topology: tpu7x:2x2x1
jax: 0.10.0
libtpu: 0.0.40
codegen_flags: <defaults>
</compile_context>

<pallas_src>
import jax
import jax.numpy as jnp
from jax.experimental import pallas as pl
from jax.experimental.pallas import tpu as pltpu


def _round_up(n: int, m: int) -> int:
    return ((n + m - 1) // m) * m


def mlp_kernel(x_ref, w1_ref, b1_ref, w2_ref, b2_ref, w3_ref, b3_ref, o_ref):
    # fc1 + ReLU  (MXU, f32 accumulation; bias add / ReLU on the VPU in f32)
    h1 = jnp.dot(x_ref[...], w1_ref[...], preferred_element_type=jnp.float32)
    h1 = jnp.maximum(h1 + b1_ref[...], 0.0)
    # dropout -> identity (eval mode)

    # fc2 + ReLU (cast the activation to the weight dtype so bf16 feeds the
    # MXU natively on the bf16 path; still accumulate in f32)
    h2 = jnp.dot(h1.astype(w2_ref.dtype), w2_ref[...],
                 preferred_element_type=jnp.float32)
    h2 = jnp.maximum(h2 + b2_ref[...], 0.0)
    # dropout -> identity (eval mode)

    # fc3 (out_features = 1): VPU multiply + XLU cross-lane reduce instead of a
    # single-output-column MXU matmul; b3 is a scalar read from SMEM.
    o_ref[...] = jnp.sum(h2 * w3_ref[...], axis=-1, keepdims=True) + b3_ref[0, 0]


def mlp_forward(x, params, *, use_bf16=False, max_batch_tile=512):
    """x: (B, sequence_len, input_dim) -> (B,) float32."""
    w1, b1, w2, b2, w3, b3 = params
    B = x.shape[0]
    K1, H1 = w1.shape
    H2 = w2.shape[1]

    x_flat = x.reshape(B, -1).astype(jnp.float32)
    assert x_flat.shape[1] == K1

    # Batch tile: multiple of 16 (legal sublane count for f32 and bf16 blocks),
    # capped so double-buffered (TB, K1) x tiles + the resident weights stay
    # comfortably inside every generation's scoped VMEM (incl. v7x's default).
    TB = min(max_batch_tile, _round_up(B, 16))
    B_pad = _round_up(B, TB)
    if B_pad != B:
        x_flat = jnp.pad(x_flat, ((0, B_pad - B), (0, 0)))

    # Present w3 (H2, 1) as a row (1, H2) for the VPU/XLU path.
    w3_row = w3.reshape(1, H2).astype(jnp.float32)
    b3_s = b3.reshape(1, 1).astype(jnp.float32)
    b1_in = b1.reshape(1, H1).astype(jnp.float32)
    b2_in = b2.reshape(1, H2).astype(jnp.float32)

    if use_bf16:
        # Halve HBM bytes on the dominant (x) stream; f32 accumulation in-kernel.
        x_in = x_flat.astype(jnp.bfloat16)
        w1_in = w1.astype(jnp.bfloat16)
        w2_in = w2.astype(jnp.bfloat16)
    else:
        x_in = x_flat
        w1_in = w1.astype(jnp.float32)
        w2_in = w2.astype(jnp.float32)

    grid = (B_pad // TB,)

    out = pl.pallas_call(
        mlp_kernel,
        out_shape=jax.ShapeDtypeStruct((B_pad, 1), jnp.float32),
        grid=grid,
        in_specs=[
            pl.BlockSpec((TB, K1), lambda i: (i, 0)),   # x: tiled over batch
            pl.BlockSpec((K1, H1), lambda i: (0, 0)),   # w1: VMEM-resident
            pl.BlockSpec((1, H1), lambda i: (0, 0)),    # b1
            pl.BlockSpec((H1, H2), lambda i: (0, 0)),   # w2: VMEM-resident
            pl.BlockSpec((1, H2), lambda i: (0, 0)),    # b2
            pl.BlockSpec((1, H2), lambda i: (0, 0)),    # w3 as a row
            pl.BlockSpec((1, 1), lambda i: (0, 0),
                         memory_space=pltpu.MemorySpace.SMEM),  # b3 scalar
        ],
        out_specs=pl.BlockSpec((TB, 1), lambda i: (i, 0)),
        compiler_params=pltpu.CompilerParams(
            dimension_semantics=("parallel",)),
    )(x_in, w1_in, b1_in, w2_in, b2_in, w3_row, b3_s)

    return out[:B, 0]  # drop batch padding, squeeze(-1)


def init_params(key, in_features, hidden_dim1, hidden_dim2):
    """uniform(-1/sqrt(fan_in), 1/sqrt(fan_in)) like torch nn.Linear."""
    def linear(key, fan_in, fan_out):
        kw, kb = jax.random.split(key)
        bound = 1.0 / jnp.sqrt(fan_in)
        w = jax.random.uniform(kw, (fan_in, fan_out), jnp.float32, -bound, bound)
        b = jax.random.uniform(kb, (1, fan_out), jnp.float32, -bound, bound)
        return w, b

    k1, k2, k3 = jax.random.split(key, 3)
    w1, b1 = linear(k1, in_features, hidden_dim1)
    w2, b2 = linear(k2, hidden_dim1, hidden_dim2)
    w3, b3 = linear(k3, hidden_dim2, 1)
    return (w1, b1, w2, b2, w3, b3)


def mlp_reference(x, params):
    """Pure-JAX reference for correctness checking."""
    w1, b1, w2, b2, w3, b3 = params
    h = x.reshape(x.shape[0], -1)
    h = jnp.maximum(h @ w1 + b1, 0.0)
    h = jnp.maximum(h @ w2 + b2, 0.0)
    return (h @ w3 + b3)[:, 0]


if __name__ == "__main__":
    # Module defaults (input_dim=15, sequence_len=46, 512/256 hidden) at a
    # small batch; exercises a non-128-aligned flattened input dim (690).
    batch = 8
    input_dim = 15
    sequence_len = 46
    hidden_dim1 = 512
    hidden_dim2 = 256

    key = jax.random.PRNGKey(0)
    kx, kp = jax.random.split(key)
    x = jax.random.normal(kx, (batch, sequence_len, input_dim), jnp.float32)
    params = init_params(kp, input_dim * sequence_len, hidden_dim1, hidden_dim2)

    y_ref = mlp_reference(x, params)

    # f32 path (strict numerical check).
    y = mlp_forward(x, params, use_bf16=False)
    jax.block_until_ready(y)
    assert y.shape == (batch,)
    assert jnp.allclose(y, y_ref, atol=1e-4, rtol=1e-4)

    # bf16 MXU-input path (v6e/v7x bandwidth optimization), f32 accumulation.
    y_bf16 = mlp_forward(x, params, use_bf16=True)
    jax.block_until_ready(y_bf16)
    assert y_bf16.shape == (batch,)
    assert jnp.allclose(y_bf16, y_ref, atol=5e-2, rtol=5e-2)

    print("KERNEL_OK")
</pallas_src>

<mosaic_0001>
module attributes {stable_mosaic.version = 11 : i64} {
  func.func @mlp_kernel(%arg0: i32, %arg1: memref<16x690xf32, #tpu.memory_space<vmem>>, %arg2: memref<690x512xf32, #tpu.memory_space<vmem>>, %arg3: memref<1x512xf32, #tpu.memory_space<vmem>>, %arg4: memref<512x256xf32, #tpu.memory_space<vmem>>, %arg5: memref<1x256xf32, #tpu.memory_space<vmem>>, %arg6: memref<1x256xf32, #tpu.memory_space<vmem>>, %arg7: memref<1x1xf32, #tpu.memory_space<smem>>, %arg8: memref<16x1xf32, #tpu.memory_space<vmem>>) attributes {dimension_semantics = [#tpu.dimension_semantics<parallel>], iteration_bounds = array<i64: 1>, scalar_prefetch = 0 : i64, scratch_operands = 0 : i64, tpu.core_type = #tpu.core_type<tc>, window_params = [{transform_indices = @transform_0, window_bounds = array<i64: 16, 690>}, {pipeline_mode = #tpu.pipeline_mode<synchronous>, transform_indices = @transform_1, window_bounds = array<i64: 690, 512>}, {pipeline_mode = #tpu.pipeline_mode<synchronous>, transform_indices = @transform_2, window_bounds = array<i64: 1, 512>}, {pipeline_mode = #tpu.pipeline_mode<synchronous>, transform_indices = @transform_3, window_bounds = array<i64: 512, 256>}, {pipeline_mode = #tpu.pipeline_mode<synchronous>, transform_indices = @transform_4, window_bounds = array<i64: 1, 256>}, {pipeline_mode = #tpu.pipeline_mode<synchronous>, transform_indices = @transform_5, window_bounds = array<i64: 1, 256>}, {transform_indices = @transform_6, window_bounds = array<i64: 1, 1>}, {transform_indices = @transform_7, window_bounds = array<i64: 16, 1>}]} {
    %c0 = arith.constant 0 : index
    %c0_0 = arith.constant 0 : index
    %0 = vector.load %arg1[%c0, %c0_0] : memref<16x690xf32, #tpu.memory_space<vmem>>, vector<16x690xf32>
    %c0_1 = arith.constant 0 : index
    %c0_2 = arith.constant 0 : index
    %1 = vector.load %arg2[%c0_1, %c0_2] : memref<690x512xf32, #tpu.memory_space<vmem>>, vector<690x512xf32>
    %cst = arith.constant dense<0.000000e+00> : vector<16x512xf32>
    %2 = tpu.matmul %0, %1, %cst {dimension_numbers = #tpu.dot_dimension_numbers<[1], [0], [0], [1], [0, 0, 1, 1], [], []>} : vector<16x690xf32>, vector<690x512xf32>, vector<16x512xf32> -> vector<16x512xf32>
    %c0_3 = arith.constant 0 : index
    %c0_4 = arith.constant 0 : index
    %3 = vector.load %arg3[%c0_3, %c0_4] : memref<1x512xf32, #tpu.memory_space<vmem>>, vector<1x512xf32>
    %4 = vector.broadcast %3 : vector<1x512xf32> to vector<16x512xf32>
    %5 = arith.addf %2, %4 : vector<16x512xf32>
    %cst_5 = arith.constant 0.000000e+00 : f32
    %6 = vector.broadcast %cst_5 : f32 to vector<16x512xf32>
    %7 = arith.maximumf %5, %6 : vector<16x512xf32>
    %c0_6 = arith.constant 0 : index
    %c0_7 = arith.constant 0 : index
    %8 = vector.load %arg4[%c0_6, %c0_7] : memref<512x256xf32, #tpu.memory_space<vmem>>, vector<512x256xf32>
    %cst_8 = arith.constant dense<0.000000e+00> : vector<16x256xf32>
    %9 = tpu.matmul %7, %8, %cst_8 {dimension_numbers = #tpu.dot_dimension_numbers<[1], [0], [0], [1], [0, 0, 1, 1], [], []>} : vector<16x512xf32>, vector<512x256xf32>, vector<16x256xf32> -> vector<16x256xf32>
    %c0_9 = arith.constant 0 : index
    %c0_10 = arith.constant 0 : index
    %10 = vector.load %arg5[%c0_9, %c0_10] : memref<1x256xf32, #tpu.memory_space<vmem>>, vector<1x256xf32>
    %11 = vector.broadcast %10 : vector<1x256xf32> to vector<16x256xf32>
    %12 = arith.addf %9, %11 : vector<16x256xf32>
    %cst_11 = arith.constant 0.000000e+00 : f32
    %13 = vector.broadcast %cst_11 : f32 to vector<16x256xf32>
    %14 = arith.maximumf %12, %13 : vector<16x256xf32>
    %c0_12 = arith.constant 0 : index
    %c0_13 = arith.constant 0 : index
    %15 = vector.load %arg6[%c0_12, %c0_13] : memref<1x256xf32, #tpu.memory_space<vmem>>, vector<1x256xf32>
    %16 = vector.broadcast %15 : vector<1x256xf32> to vector<16x256xf32>
    %17 = arith.mulf %14, %16 : vector<16x256xf32>
    %cst_14 = arith.constant dense<0.000000e+00> : vector<16xf32>
    %18 = vector.multi_reduction <add>, %17, %cst_14 [1] : vector<16x256xf32> to vector<16xf32>
    %19 = vector.shape_cast %18 : vector<16xf32> to vector<16x1xf32>
    %c0_15 = arith.constant 0 : index
    %c0_16 = arith.constant 0 : index
    %20 = memref.load %arg7[%c0_15, %c0_16] : memref<1x1xf32, #tpu.memory_space<smem>>
    %21 = vector.broadcast %20 : f32 to vector<16x1xf32>
    %22 = arith.addf %19, %21 : vector<16x1xf32>
    %c0_17 = arith.constant 0 : index
    %c0_18 = arith.constant 0 : index
    %23 = vector.load %arg8[%c0_17, %c0_18] : memref<16x1xf32, #tpu.memory_space<vmem>>, vector<16x1xf32>
    tpu.vector_store %arg8[%c0_17, %c0_18], %22 {strides = array<i32>} : memref<16x1xf32, #tpu.memory_space<vmem>>, vector<16x1xf32>,
    return
  }
  func.func @transform_0(%arg0: i32) -> (i32, i32) {
    %c0_i32 = arith.constant 0 : i32
    %c0_i32_0 = arith.constant 0 : i32
    return %arg0, %c0_i32 : i32, i32
  }
  func.func @transform_1(%arg0: i32) -> (i32, i32) {
    %c0_i32 = arith.constant 0 : i32
    %c0_i32_0 = arith.constant 0 : i32
    %c0_i32_1 = arith.constant 0 : i32
    return %c0_i32, %c0_i32_0 : i32, i32
  }
  func.func @transform_2(%arg0: i32) -> (i32, i32) {
    %c0_i32 = arith.constant 0 : i32
    %c0_i32_0 = arith.constant 0 : i32
    %c0_i32_1 = arith.constant 0 : i32
    return %c0_i32, %c0_i32_0 : i32, i32
  }
  func.func @transform_3(%arg0: i32) -> (i32, i32) {
    %c0_i32 = arith.constant 0 : i32
    %c0_i32_0 = arith.constant 0 : i32
    %c0_i32_1 = arith.constant 0 : i32
    return %c0_i32, %c0_i32_0 : i32, i32
  }
  func.func @transform_4(%arg0: i32) -> (i32, i32) {
    %c0_i32 = arith.constant 0 : i32
    %c0_i32_0 = arith.constant 0 : i32
    %c0_i32_1 = arith.constant 0 : i32
    return %c0_i32, %c0_i32_0 : i32, i32
  }
  func.func @transform_5(%arg0: i32) -> (i32, i32) {
    %c0_i32 = arith.constant 0 : i32
    %c0_i32_0 = arith.constant 0 : i32
    %c0_i32_1 = arith.constant 0 : i32
    return %c0_i32, %c0_i32_0 : i32, i32
  }
  func.func @transform_6(%arg0: i32) -> (i32, i32) {
    %c0_i32 = arith.constant 0 : i32
    %c0_i32_0 = arith.constant 0 : i32
    %c0_i32_1 = arith.constant 0 : i32
    return %c0_i32, %c0_i32_0 : i32, i32
  }
  func.func @transform_7(%arg0: i32) -> (i32, i32) {
    %c0_i32 = arith.constant 0 : i32
    %c0_i32_0 = arith.constant 0 : i32
    return %arg0, %c0_i32 : i32, i32
  }
}

</mosaic_0001>

<bundles_post_ra>
// kernel: tpu_custom_call.1
= control target key start
LH: loop header
LB: loop body
LE: loop exit
PB: predicated region body
PF: predicated region fallthrough
CT: control target
= control target key end

     0   :  { %13 = vsyncpa [#allocation4], 0  ;;  %s2185_s0 = inlined_call_operand.hbm [shape: f32[16,690], index: 0, kind: input, shape index: {}]   ;;  %s2186_s1 = inlined_call_operand.hbm [shape: f32[690,512], index: 1, kind: input, shape index: {}]   ;;  %s2187_s2 = inlined_call_operand.hbm [shape: f32[1,512], index: 2, kind: input, shape index: {}]   ;;  %s2188_s3 = inlined_call_operand.hbm [shape: f32[512,256], index: 3, kind: input, shape index: {}]   ;;  %s2189_s4 = inlined_call_operand.hbm [shape: f32[1,256], index: 4, kind: input, shape index: {}]   ;;  %s2190_s5 = inlined_call_operand.hbm [shape: f32[1,256], index: 5, kind: input, shape index: {}]   ;;  %s2191_s6 = inlined_call_operand.<no memory space> [shape: f32[1,1], index: 6, kind: input, shape index: {}]   ;;  %s2192_s7 = inlined_call_operand.vmem [shape: f32[16,1], index: 7, kind: output, shape index: {}]  }
   0x1   :  { %14 = vsyncpa [#allocation6], 0 }
   0x2   :  { %15 = vsyncpa [#allocation9], 0 }
   0x3   :  { %16 = vsyncpa [#allocation12], 0  ;;  %s1974_s24 = smov [#allocation5]   ;;  %s1834_s28 = scalar_lea.hbm %s2186_s1, 44544 }
   0x4   :  { %s34_s25 = sshll.u32 %s1974_s24, 4  ;;  %p1835_p0 = scmp.ne.s32.totalorder %s2186_s1, %s1834_s28  ;;  %s35_s25 = int_to_ptr.vmem [resolvable:$true] %s34_s25 }
   0x5   :  { %p1838_p1 = scmp.lt.u32.totalorder %s1834_s28, %s2186_s1 }
   0x7   :  { %p1840_p2 = pnand %p1838_p1, %p1835_p0 }
   0x9   :  { %1843 = shalt.err (!%p1840_p2)
}
   0xa   :  { %s1844_s10 = scalar_lea.vmem %s35_s25, 44544  ;;  %p1849_p4 = scmp.lt.s32.totalorder %s35_s25, %s35_s25 }
   0xb   :  { %p1845_p3 = scmp.ne.s32.totalorder %s35_s25, %s1844_s10  ;;  %p1850_p5 = scmp.lt.s32.totalorder %s1844_s10, %s1844_s10 }
   0xd   :  { %p1851_p6 = por %p1850_p5, %p1849_p4 }
   0xf   :  { %p1852_p7 = pnand %p1851_p6, %p1845_p3 }
  0x11   :  { %1855 = shalt.err (!%p1852_p7)
}
  0x12   :  { %s1975_s11 = smov 512   ;;  %s1976_s12 = smov 32  }
  0x13   :  { %40 = dma.hbm_to_vmem [thread:$0]  %s2186_s1, 44544, %s35_s25, [#allocation6], %s1975_s11, %s1975_s11, %s1976_s12  }
  0x14   :  { %s1977_s15 = smov [#allocation8]   ;;  %s1856_s19 = scalar_lea.hbm %s2188_s3, 16384 }
  0x15   :  { %s56_s16 = sshll.u32 %s1977_s15, 4  ;;  %p1857_p8 = scmp.ne.s32.totalorder %s2188_s3, %s1856_s19  ;;  %s57_s16 = int_to_ptr.vmem [resolvable:$true] %s56_s16 }
  0x16   :  { %p1860_p9 = scmp.lt.u32.totalorder %s1856_s19, %s2188_s3 }
  0x18   :  { %p1862_p10 = pnand %p1860_p9, %p1857_p8 }
  0x1a   :  { %1865 = shalt.err (!%p1862_p10)
}
  0x1b   :  { %s1866_s24 = scalar_lea.vmem %s57_s16, 16384  ;;  %p1871_p12 = scmp.lt.s32.totalorder %s57_s16, %s57_s16 }
  0x1c   :  { %p1867_p11 = scmp.ne.s32.totalorder %s57_s16, %s1866_s24  ;;  %p1872_p13 = scmp.lt.s32.totalorder %s1866_s24, %s1866_s24 }
  0x1e   :  { %p1873_p0 = por %p1872_p13, %p1871_p12 }
  0x20   :  { %p1874_p1 = pnand %p1873_p0, %p1867_p11 }
  0x22   :  { %1877 = shalt.err (!%p1874_p1)
}
  0x23   :  { %s1978_s1 = smov 256   ;;  %s1979_s25 = smov 16  }
  0x24   :  { %62 = dma.hbm_to_vmem [thread:$0]  %s2188_s3, 16384, %s57_s16, [#allocation9], %s1978_s1, %s1978_s1, %s1979_s25  }
  0x25   :  { %s1980_s28 = smov [#allocation3]   ;;  %s1878_s9 = scalar_lea.hbm %s2185_s0, 1536 }
  0x26   :  { %s22_s29 = sshll.u32 %s1980_s28, 4  ;;  %p1879_p2 = scmp.ne.s32.totalorder %s2185_s0, %s1878_s9  ;;  %s23_s29 = int_to_ptr.vmem [resolvable:$true] %s22_s29 }
  0x27   :  { %p1882_p3 = scmp.lt.u32.totalorder %s1878_s9, %s2185_s0 }
  0x29   :  { %p1884_p4 = pnand %p1882_p3, %p1879_p2 }
  0x2b   :  { %1887 = shalt.err (!%p1884_p4)
}
  0x2c   :  { %s1888_s14 = scalar_lea.vmem %s23_s29, 1536  ;;  %p1893_p6 = scmp.lt.s32.totalorder %s23_s29, %s23_s29 }
  0x2d   :  { %p1889_p5 = scmp.ne.s32.totalorder %s23_s29, %s1888_s14  ;;  %p1894_p7 = scmp.lt.s32.totalorder %s1888_s14, %s1888_s14 }
  0x2f   :  { %p1895_p8 = por %p1894_p7, %p1893_p6 }
  0x31   :  { %p1896_p9 = pnand %p1895_p8, %p1889_p5 }
  0x33   :  { %1899 = shalt.err (!%p1896_p9)
}
  0x34   :  { %s1981_s3 = smov 768   ;;  %s1982_s15 = smov 48  }
  0x35   :  { %28 = dma.hbm_to_vmem [thread:$0]  %s2185_s0, 1536, %s23_s29, [#allocation4], %s1981_s3, %s1981_s3, %s1982_s15  }
  0x36   :  { %s1983_s18 = smov [#allocation7]   ;;  %s1984_s20 = smov [#allocation10]  }
  0x37   :  { %s47_s19 = sshll.u32 %s1983_s18, 4  ;;  %s69_s21 = sshll.u32 %s1984_s20, 4  ;;  %s48_s19 = int_to_ptr.vmem [resolvable:$true] %s47_s19  ;;  %s70_s21 = int_to_ptr.vmem [resolvable:$true] %s69_s21 }
  0x38   :  { %s1900_s24 = scalar_lea.hbm %s2187_s2, 64 }
  0x39   :  { %p1901_p10 = scmp.ne.s32.totalorder %s2187_s2, %s1900_s24  ;;  %p1904_p11 = scmp.lt.u32.totalorder %s1900_s24, %s2187_s2 }
  0x3b   :  { %p1906_p12 = pnand %p1904_p11, %p1901_p10 }
  0x3d   :  { %1909 = shalt.err (!%p1906_p12)
}
  0x3e   :  { %s1910_s0 = scalar_lea.vmem %s48_s19, 64  ;;  %p1915_p0 = scmp.lt.s32.totalorder %s48_s19, %s48_s19 }
  0x3f   :  { %p1911_p13 = scmp.ne.s32.totalorder %s48_s19, %s1910_s0  ;;  %p1916_p1 = scmp.lt.s32.totalorder %s1910_s0, %s1910_s0 }
  0x41   :  { %p1917_p2 = por %p1916_p1, %p1915_p0 }
  0x43   :  { %p1918_p3 = pnand %p1917_p2, %p1911_p13 }
  0x45   :  { %1921 = shalt.err (!%p1918_p3)
}
  0x46   :  { %50 = dma.hbm_to_vmem [thread:$0]  %s2187_s2, 64, %s48_s19, [#allocation6]  }
  0x47   :  { %s1922_s9 = scalar_lea.hbm %s2189_s4, 32 }
  0x48   :  { %p1923_p4 = scmp.ne.s32.totalorder %s2189_s4, %s1922_s9  ;;  %p1926_p5 = scmp.lt.u32.totalorder %s1922_s9, %s2189_s4 }
  0x4a   :  { %p1928_p6 = pnand %p1926_p5, %p1923_p4 }
  0x4c   :  { %1931 = shalt.err (!%p1928_p6)
}
  0x4d   :  { %s1932_s14 = scalar_lea.vmem %s70_s21, 32  ;;  %p1937_p8 = scmp.lt.s32.totalorder %s70_s21, %s70_s21 }
  0x4e   :  { %p1933_p7 = scmp.ne.s32.totalorder %s70_s21, %s1932_s14  ;;  %p1938_p9 = scmp.lt.s32.totalorder %s1932_s14, %s1932_s14 }
  0x50   :  { %p1939_p10 = por %p1938_p9, %p1937_p8 }
  0x52   :  { %p1940_p11 = pnand %p1939_p10, %p1933_p7 }
  0x54   :  { %1943 = shalt.err (!%p1940_p11)
}
  0x55   :  { %72 = dma.hbm_to_vmem [thread:$0]  %s2189_s4, 32, %s70_s21, [#allocation9]  }
  0x56   :  { %s1985_s15 = smov [#allocation11]   ;;  %s1944_s19 = scalar_lea.hbm %s2190_s5, 32 }
  0x57   :  { %s79_s16 = sshll.u32 %s1985_s15, 4  ;;  %p1945_p12 = scmp.ne.s32.totalorder %s2190_s5, %s1944_s19  ;;  %s80_s16 = int_to_ptr.vmem [resolvable:$true] %s79_s16 }
  0x58   :  { %p1948_p13 = scmp.lt.u32.totalorder %s1944_s19, %s2190_s5 }
  0x5a   :  { %p1950_p0 = pnand %p1948_p13, %p1945_p12 }
  0x5c   :  { %1953 = shalt.err (!%p1950_p0)
}
  0x5d   :  { %s1954_s1 = scalar_lea.vmem %s80_s16, 32  ;;  %p1959_p2 = scmp.lt.s32.totalorder %s80_s16, %s80_s16 }
  0x5e   :  { %p1955_p1 = scmp.ne.s32.totalorder %s80_s16, %s1954_s1  ;;  %p1960_p3 = scmp.lt.s32.totalorder %s1954_s1, %s1954_s1 }
  0x60   :  { %p1961_p4 = por %p1960_p3, %p1959_p2 }
  0x62   :  { %p1962_p5 = pnand %p1961_p4, %p1955_p1 }
  0x64   :  { %1965 = shalt.err (!%p1962_p5)
}
  0x65   :  { %82 = dma.hbm_to_vmem [thread:$0]  %s2190_s5, 32, %s80_s16, [#allocation12]  }
  0x66   :  { %1966 = dma.done.wait [#allocation4], 1536  }
  0x67   :  { %1967 = vsyncadd [#allocation4], 4294965760 }
  0x68   :  { %1968 = dma.done.wait [#allocation6], 44608  }
  0x69   :  { %1969 = vsyncadd [#allocation6], 4294922688 }
  0x6a   :  { %1970 = dma.done.wait [#allocation9], 16416  }
  0x6b   :  { %1971 = vsyncadd [#allocation9], 4294950880 }
  0x6c   :  { %1972 = dma.done.wait [#allocation12], 32  }
  0x6d   :  { %1973 = vsyncadd [#allocation12], 4294967264  ;;  %v116_v0 = vld [vmem:[#allocation5 + $0x8] sm:$0xff]  ;;  %v115_v5 = vld [vmem:[#allocation5] sm:$0xff]  ;;  %vm485_vm0 = vcmask 408576   ;;  %vm492_vm1 = vcmask 1041408  }
  0x6e   :  { %v120_v1 = vld [vmem:[#allocation5 + $0x28] sm:$0xff]  ;;  %v119_v6 = vld [vmem:[#allocation5 + $0x20] sm:$0xff]  ;;  %vm1299_vm2 = vcmask 7168  }
  0x6f   :  { %v244_v2 = vld [vmem:[#allocation5 + $0x408] sm:$0xff]  ;;  %v1318_v3 = vpack.c.bf16 %v120_v1, %v116_v0  ;;  %v1320_v8 = vpack.c.bf16 %v119_v6, %v115_v5  ;;  %v243_v9 = vld [vmem:[#allocation5 + $0x400] sm:$0xff] }
  0x70   :  { %v248_v4 = vld [vmem:[#allocation5 + $0x428] sm:$0xff]  ;;  %v247_v10 = vld [vmem:[#allocation5 + $0x420] sm:$0xff] }
  0x71   :  { %v1382_v7 = vpack.c.bf16 %v248_v4, %v244_v2  ;;  %v124_v11 = vld [vmem:[#allocation5 + $0x48] sm:$0xff]  ;;  %1319 = vmatprep.subr.bf16.mxu1 %v1318_v3  ;;  %v1384_v12 = vpack.c.bf16 %v247_v10, %v243_v9  ;;  %v123_v18 = vld [vmem:[#allocation5 + $0x40] sm:$0xff] }
  0x72   :  { %v128_v13 = vld [vmem:[#allocation5 + $0x68] sm:$0xff]  ;;  %1321 = vmatpush1.bf16.msra.mxu1 %v1320_v8  ;;  %v127_v19 = vld [vmem:[#allocation5 + $0x60] sm:$0xff] }
  0x73   :  { %v252_v14 = vld [vmem:[#allocation5 + $0x448] sm:$0xff]  ;;  %1383 = vmatprep.subr.bf16.mxu0 %v1382_v7  ;;  %v1322_v16 = vpack.c.bf16 %v128_v13, %v124_v11  ;;  %v251_v20 = vld [vmem:[#allocation5 + $0x440] sm:$0xff]  ;;  %v1324_v21 = vpack.c.bf16 %v127_v19, %v123_v18 }
  0x74   :  { %v256_v15 = vld [vmem:[#allocation5 + $0x468] sm:$0xff]  ;;  %1385 = vmatpush1.bf16.msra.mxu0 %v1384_v12  ;;  %v255_v22 = vld [vmem:[#allocation5 + $0x460] sm:$0xff] }
  0x75   :  { %v1386_v17 = vpack.c.bf16 %v256_v15, %v252_v14  ;;  %v132_v23 = vld [vmem:[#allocation5 + $0x88] sm:$0xff]  ;;  %1323 = vmatprep.subr.bf16.mxu1 %v1322_v16  ;;  %v1388_v25 = vpack.c.bf16 %v255_v22, %v251_v20  ;;  %v131_v29 = vld [vmem:[#allocation5 + $0x80] sm:$0xff] }
  0x76   :  { %v136_v24 = vld [vmem:[#allocation5 + $0xa8] sm:$0xff]  ;;  %v135_v31 = vld [vmem:[#allocation5 + $0xa0] sm:$0xff]  ;;  %1325 = vmatpush1.bf16.msra.mxu1 %v1324_v21 }
  0x77   :  { %1387 = vmatprep.subr.bf16.mxu0 %v1386_v17  ;;  %v1326_v26 = vpack.c.bf16 %v136_v24, %v132_v23  ;;  %v260_v27 = vld [vmem:[#allocation5 + $0x488] sm:$0xff]  ;;  %v259_v32 = vld [vmem:[#allocation5 + $0x480] sm:$0xff]  ;;  %v1328_v34 = vpack.c.bf16 %v135_v31, %v131_v29 }
  0x78   :  { %v264_v28 = vld [vmem:[#allocation5 + $0x4a8] sm:$0xff]  ;;  %v263_v33 = vld [vmem:[#allocation5 + $0x4a0] sm:$0xff]  ;;  %1389 = vmatpush1.bf16.msra.mxu0 %v1388_v25 }
  0x79   :  { %v1390_v30 = vpack.c.bf16 %v264_v28, %v260_v27  ;;  %v140_v35 = vld [vmem:[#allocation5 + $0xc8] sm:$0xff]  ;;  %1327 = vmatprep.subr.bf16.mxu1 %v1326_v26  ;;  %v1392_v38 = vpack.c.bf16 %v263_v33, %v259_v32  ;;  %v139_v41 = vld [vmem:[#allocation5 + $0xc0] sm:$0xff] }
  0x7a   :  { %v144_v36 = vld [vmem:[#allocation5 + $0xe8] sm:$0xff]  ;;  %v143_v42 = vld [vmem:[#allocation5 + $0xe0] sm:$0xff]  ;;  %1329 = vmatpush1.bf16.msra.mxu1 %v1328_v34 }
  0x7b   :  { %v268_v37 = vld [vmem:[#allocation5 + $0x4c8] sm:$0xff]  ;;  %v1330_v39 = vpack.c.bf16 %v144_v36, %v140_v35  ;;  %1391 = vmatprep.subr.bf16.mxu0 %v1390_v30  ;;  %v267_v44 = vld [vmem:[#allocation5 + $0x4c0] sm:$0xff]  ;;  %v1332_v50 = vpack.c.bf16 %v143_v42, %v139_v41 }
  0x7c   :  { %v272_v40 = vld [vmem:[#allocation5 + $0x4e8] sm:$0xff]  ;;  %v271_v45 = vld [vmem:[#allocation5 + $0x4e0] sm:$0xff]  ;;  %1393 = vmatpush1.bf16.msra.mxu0 %v1392_v38 }
  0x7d   :  { %v1394_v43 = vpack.c.bf16 %v272_v40, %v268_v37  ;;  %v148_v46 = vld [vmem:[#allocation5 + $0x108] sm:$0xff]  ;;  %1331 = vmatprep.subr.bf16.mxu1 %v1330_v39  ;;  %v1396_v51 = vpack.c.bf16 %v271_v45, %v267_v44  ;;  %v147_v53 = vld [vmem:[#allocation5 + $0x100] sm:$0xff] }
  0x7e   :  { %v152_v47 = vld [vmem:[#allocation5 + $0x128] sm:$0xff]  ;;  %v151_v54 = vld [vmem:[#allocation5 + $0x120] sm:$0xff]  ;;  %1333 = vmatpush1.bf16.msra.mxu1 %v1332_v50 }
  0x7f   :  { %v276_v48 = vld [vmem:[#allocation5 + $0x508] sm:$0xff]  ;;  %v1334_v52 = vpack.c.bf16 %v152_v47, %v148_v46  ;;  %v275_v55 = vld [vmem:[#allocation5 + $0x500] sm:$0xff]  ;;  %1395 = vmatprep.subr.bf16.mxu0 %v1394_v43  ;;  %v1336_v62 = vpack.c.bf16 %v151_v54, %v147_v53 }
  0x80   :  { %v280_v49 = vld [vmem:[#allocation5 + $0x528] sm:$0xff]  ;;  %v279_v57 = vld [vmem:[#allocation5 + $0x520] sm:$0xff]  ;;  %1397 = vmatpush1.bf16.msra.mxu0 %v1396_v51 }
  0x81   :  { %v1398_v56 = vpack.c.bf16 %v280_v49, %v276_v48  ;;  %v156_v58 = vld [vmem:[#allocation5 + $0x148] sm:$0xff]  ;;  %1335 = vmatprep.subr.bf16.mxu1 %v1334_v52  ;;  %v1400_v63 = vpack.c.bf16 %v279_v57, %v275_v55  ;;  %v155_v1 = vld [vmem:[#allocation5 + $0x140] sm:$0xff] }
  0x82   :  { %v160_v59 = vld [vmem:[#allocation5 + $0x168] sm:$0xff]  ;;  %v159_v2 = vld [vmem:[#allocation5 + $0x160] sm:$0xff]  ;;  %1337 = vmatpush1.bf16.msra.mxu1 %v1336_v62 }
  0x83   :  { %v284_v60 = vld [vmem:[#allocation5 + $0x548] sm:$0xff]  ;;  %v1338_v0 = vpack.c.bf16 %v160_v59, %v156_v58  ;;  %v283_v3 = vld [vmem:[#allocation5 + $0x540] sm:$0xff]  ;;  %1399 = vmatprep.subr.bf16.mxu0 %v1398_v56  ;;  %v1340_v10 = vpack.c.bf16 %v159_v2, %v155_v1 }
  0x84   :  { %v288_v61 = vld [vmem:[#allocation5 + $0x568] sm:$0xff]  ;;  %v287_v5 = vld [vmem:[#allocation5 + $0x560] sm:$0xff]  ;;  %1401 = vmatpush1.bf16.msra.mxu0 %v1400_v63 }
  0x85   :  { %v1402_v4 = vpack.c.bf16 %v288_v61, %v284_v60  ;;  %v164_v6 = vld [vmem:[#allocation5 + $0x188] sm:$0xff]  ;;  %1339 = vmatprep.subr.bf16.mxu1 %v1338_v0  ;;  %v1404_v11 = vpack.c.bf16 %v287_v5, %v283_v3  ;;  %v163_v13 = vld [vmem:[#allocation5 + $0x180] sm:$0xff] }
  0x86   :  { %v168_v7 = vld [vmem:[#allocation5 + $0x1a8] sm:$0xff]  ;;  %v167_v14 = vld [vmem:[#allocation5 + $0x1a0] sm:$0xff]  ;;  %1341 = vmatpush1.bf16.msra.mxu1 %v1340_v10 }
  0x87   :  { %v292_v8 = vld [vmem:[#allocation5 + $0x588] sm:$0xff]  ;;  %v1342_v12 = vpack.c.bf16 %v168_v7, %v164_v6  ;;  %v291_v15 = vld [vmem:[#allocation5 + $0x580] sm:$0xff]  ;;  %1403 = vmatprep.subr.bf16.mxu0 %v1402_v4  ;;  %v1344_v22 = vpack.c.bf16 %v167_v14, %v163_v13 }
  0x88   :  { %v296_v9 = vld [vmem:[#allocation5 + $0x5a8] sm:$0xff]  ;;  %v295_v17 = vld [vmem:[#allocation5 + $0x5a0] sm:$0xff]  ;;  %1405 = vmatpush1.bf16.msra.mxu0 %v1404_v11 }
  0x89   :  { %v1406_v16 = vpack.c.bf16 %v296_v9, %v292_v8  ;;  %v172_v18 = vld [vmem:[#allocation5 + $0x1c8] sm:$0xff]  ;;  %1343 = vmatprep.subr.bf16.mxu1 %v1342_v12  ;;  %v1408_v23 = vpack.c.bf16 %v295_v17, %v291_v15  ;;  %v171_v25 = vld [vmem:[#allocation5 + $0x1c0] sm:$0xff] }
  0x8a   :  { %v176_v19 = vld [vmem:[#allocation5 + $0x1e8] sm:$0xff]  ;;  %v175_v26 = vld [vmem:[#allocation5 + $0x1e0] sm:$0xff]  ;;  %1345 = vmatpush1.bf16.msra.mxu1 %v1344_v22 }
  0x8b   :  { %v300_v20 = vld [vmem:[#allocation5 + $0x5c8] sm:$0xff]  ;;  %v1346_v24 = vpack.c.bf16 %v176_v19, %v172_v18  ;;  %v299_v27 = vld [vmem:[#allocation5 + $0x5c0] sm:$0xff]  ;;  %1407 = vmatprep.subr.bf16.mxu0 %v1406_v16  ;;  %v1348_v34 = vpack.c.bf16 %v175_v26, %v171_v25  ;;  %v2101_v19 = vld [vmem:[#allocation3 + $0x18] sm:$0xff] }
  0x8c   :  { %v304_v21 = vld [vmem:[#allocation5 + $0x5e8] sm:$0xff]  ;;  %v303_v29 = vld [vmem:[#allocation5 + $0x5e0] sm:$0xff]  ;;  %1409 = vmatpush1.bf16.msra.mxu0 %v1408_v23  ;;  %646 = vmatprep.mubr.f32.mxu0 %v2101_v19 }
  0x8d   :  { %v1410_v28 = vpack.c.bf16 %v304_v21, %v300_v20  ;;  %v180_v30 = vld [vmem:[#allocation5 + $0x208] sm:$0xff]  ;;  %1347 = vmatprep.subr.bf16.mxu1 %v1346_v24  ;;  %v1412_v35 = vpack.c.bf16 %v303_v29, %v299_v27  ;;  %v179_v37 = vld [vmem:[#allocation5 + $0x200] sm:$0xff] }
  0x8e   :  { %v184_v31 = vld [vmem:[#allocation5 + $0x228] sm:$0xff]  ;;  %v183_v38 = vld [vmem:[#allocation5 + $0x220] sm:$0xff]  ;;  %1349 = vmatpush1.bf16.msra.mxu1 %v1348_v34 }
  0x8f   :  { %v308_v32 = vld [vmem:[#allocation5 + $0x608] sm:$0xff]  ;;  %v1350_v36 = vpack.c.bf16 %v184_v31, %v180_v30  ;;  %v307_v39 = vld [vmem:[#allocation5 + $0x600] sm:$0xff]  ;;  %1411 = vmatprep.subr.bf16.mxu0 %v1410_v28  ;;  %v1352_v46 = vpack.c.bf16 %v183_v38, %v179_v37 }
  0x90   :  { %v312_v33 = vld [vmem:[#allocation5 + $0x628] sm:$0xff]  ;;  %v311_v41 = vld [vmem:[#allocation5 + $0x620] sm:$0xff]  ;;  %1413 = vmatpush1.bf16.msra.mxu0 %v1412_v35 }
  0x91   :  { %v1414_v40 = vpack.c.bf16 %v312_v33, %v308_v32  ;;  %v188_v42 = vld [vmem:[#allocation5 + $0x248] sm:$0xff]  ;;  %1351 = vmatprep.subr.bf16.mxu1 %v1350_v36  ;;  %v1416_v47 = vpack.c.bf16 %v311_v41, %v307_v39  ;;  %v187_v49 = vld [vmem:[#allocation5 + $0x240] sm:$0xff] }
  0x92   :  { %v192_v43 = vld [vmem:[#allocation5 + $0x268] sm:$0xff]  ;;  %v191_v50 = vld [vmem:[#allocation5 + $0x260] sm:$0xff]  ;;  %1353 = vmatpush1.bf16.msra.mxu1 %v1352_v46 }
  0x93   :  { %v316_v44 = vld [vmem:[#allocation5 + $0x648] sm:$0xff]  ;;  %v1354_v48 = vpack.c.bf16 %v192_v43, %v188_v42  ;;  %v315_v51 = vld [vmem:[#allocation5 + $0x640] sm:$0xff]  ;;  %1415 = vmatprep.subr.bf16.mxu0 %v1414_v40  ;;  %v1356_v58 = vpack.c.bf16 %v191_v50, %v187_v49 }
  0x94   :  { %v320_v45 = vld [vmem:[#allocation5 + $0x668] sm:$0xff]  ;;  %v319_v53 = vld [vmem:[#allocation5 + $0x660] sm:$0xff]  ;;  %1417 = vmatpush1.bf16.msra.mxu0 %v1416_v47 }
  0x95   :  { %v1418_v52 = vpack.c.bf16 %v320_v45, %v316_v44  ;;  %v196_v54 = vld [vmem:[#allocation5 + $0x288] sm:$0xff]  ;;  %1355 = vmatprep.subr.bf16.mxu1 %v1354_v48  ;;  %v1420_v59 = vpack.c.bf16 %v319_v53, %v315_v51  ;;  %v195_v61 = vld [vmem:[#allocation5 + $0x280] sm:$0xff] }
  0x96   :  { %v200_v55 = vld [vmem:[#allocation5 + $0x2a8] sm:$0xff]  ;;  %v199_v62 = vld [vmem:[#allocation5 + $0x2a0] sm:$0xff]  ;;  %1357 = vmatpush1.bf16.msra.mxu1 %v1356_v58 }
  0x97   :  { %v324_v56 = vld [vmem:[#allocation5 + $0x688] sm:$0xff]  ;;  %v1358_v60 = vpack.c.bf16 %v200_v55, %v196_v54  ;;  %v323_v63 = vld [vmem:[#allocation5 + $0x680] sm:$0xff]  ;;  %1419 = vmatprep.subr.bf16.mxu0 %v1418_v52  ;;  %v1360_v6 = vpack.c.bf16 %v199_v62, %v195_v61 }
  0x98   :  { %v328_v57 = vld [vmem:[#allocation5 + $0x6a8] sm:$0xff]  ;;  %v327_v1 = vld [vmem:[#allocation5 + $0x6a0] sm:$0xff]  ;;  %1421 = vmatpush1.bf16.msra.mxu0 %v1420_v59 }
  0x99   :  { %v1422_v0 = vpack.c.bf16 %v328_v57, %v324_v56  ;;  %v204_v2 = vld [vmem:[#allocation5 + $0x2c8] sm:$0xff]  ;;  %v203_v7 = vld [vmem:[#allocation5 + $0x2c0] sm:$0xff]  ;;  %1359 = vmatprep.subr.bf16.mxu1 %v1358_v60  ;;  %v1424_v8 = vpack.c.bf16 %v327_v1, %v323_v63  ;;  %v122_v1 = vld [vmem:[#allocation5 + $0x38] sm:$0xff] }
  0x9a   :  { %v208_v3 = vld [vmem:[#allocation5 + $0x2e8] sm:$0xff]  ;;  %v207_v10 = vld [vmem:[#allocation5 + $0x2e0] sm:$0xff]  ;;  %1361 = vmatpush1.bf16.msra.mxu1 %v1360_v6 }
  0x9b   :  { %v332_v4 = vld [vmem:[#allocation5 + $0x6c8] sm:$0xff]  ;;  %v1362_v9 = vpack.c.bf16 %v208_v3, %v204_v2  ;;  %v331_v11 = vld [vmem:[#allocation5 + $0x6c0] sm:$0xff]  ;;  %1423 = vmatprep.subr.bf16.mxu0 %v1422_v0  ;;  %v1364_v20 = vpack.c.bf16 %v207_v10, %v203_v7  ;;  %v118_v0 = vld [vmem:[#allocation5 + $0x18] sm:$0xff] }
  0x9c   :  { %v336_v5 = vld [vmem:[#allocation5 + $0x6e8] sm:$0xff]  ;;  %v335_v12 = vld [vmem:[#allocation5 + $0x6e0] sm:$0xff]  ;;  %1425 = vmatpush1.bf16.msra.mxu0 %v1424_v8  ;;  %v1490_v6 = vpack.c.bf16 %v122_v1, %v118_v0  ;;  %v117_v8 = vld [vmem:[#allocation5 + $0x10] sm:$0xff] }
  0x9d   :  { %v1426_v13 = vpack.c.bf16 %v336_v5, %v332_v4  ;;  %v212_v14 = vld [vmem:[#allocation5 + $0x308] sm:$0xff]  ;;  %1363 = vmatprep.subr.bf16.mxu1 %v1362_v9  ;;  %v1428_v21 = vpack.c.bf16 %v335_v12, %v331_v11  ;;  %v211_v23 = vld [vmem:[#allocation5 + $0x300] sm:$0xff]  ;;  %v121_v9 = vld [vmem:[#allocation5 + $0x30] sm:$0xff] }
  0x9e   :  { %v216_v15 = vld [vmem:[#allocation5 + $0x328] sm:$0xff]  ;;  %v215_v24 = vld [vmem:[#allocation5 + $0x320] sm:$0xff]  ;;  %1365 = vmatpush1.bf16.msra.mxu1 %v1364_v20  ;;  %v126_v12 = vld [vmem:[#allocation5 + $0x58] sm:$0xff]  ;;  %v1492_v20 = vpack.c.bf16 %v121_v9, %v117_v8 }
  0x9f   :  { %v2098_v16 = vld [vmem:[#allocation3 + $0x8] sm:$0xff]  ;;  %v1366_v22 = vpack.c.bf16 %v216_v15, %v212_v14  ;;  %v339_v25 = vld [vmem:[#allocation5 + $0x700] sm:$0xff]  ;;  %1427 = vmatprep.subr.bf16.mxu0 %v1426_v13  ;;  %v1368_v32 = vpack.c.bf16 %v215_v24, %v211_v23  ;;  %v130_v13 = vld [vmem:[#allocation5 + $0x78] sm:$0xff] }
  0xa0   :  { %v340_v17 = vld [vmem:[#allocation5 + $0x708] sm:$0xff]  ;;  %569 = vmatprep.mubr.f32.mxu1 %v2098_v16  ;;  %v343_v27 = vld [vmem:[#allocation5 + $0x720] sm:$0xff]  ;;  %1429 = vmatpush1.bf16.msra.mxu0 %v1428_v21  ;;  %v125_v24 = vld [vmem:[#allocation5 + $0x50] sm:$0xff] }
  0xa1   :  { %v344_v18 = vld [vmem:[#allocation5 + $0x728] sm:$0xff]  ;;  %1367 = vmatprep.subr.bf16.mxu1 %v1366_v22  ;;  %v1432_v33 = vpack.c.bf16 %v343_v27, %v339_v25  ;;  %v219_v35 = vld [vmem:[#allocation5 + $0x340] sm:$0xff]  ;;  %v1494_v22 = vpack.c.bf16 %v130_v13, %v126_v12  ;;  %v129_v25 = vld [vmem:[#allocation5 + $0x70] sm:$0xff] }
  0xa2   :  { %v1430_v26 = vpack.c.bf16 %v344_v18, %v340_v17  ;;  %v220_v28 = vld [vmem:[#allocation5 + $0x348] sm:$0xff]  ;;  %v223_v36 = vld [vmem:[#allocation5 + $0x360] sm:$0xff]  ;;  %1369 = vmatpush1.bf16.msra.mxu1 %v1368_v32  ;;  %v2106_v18 = vld [vmem:[#allocation3 + $0x10] sm:$0xff]  ;;  %v1496_v32 = vpack.c.bf16 %v129_v25, %v125_v24 }
  0xa3   :  { %v224_v29 = vld [vmem:[#allocation5 + $0x368] sm:$0xff]  ;;  %v347_v37 = vld [vmem:[#allocation5 + $0x740] sm:$0xff]  ;;  %v1372_v44 = vpack.c.bf16 %v223_v36, %v219_v35  ;;  %v133_v36 = vld [vmem:[#allocation5 + $0x90] sm:$0xff] }
  0xa4   :  { %v348_v30 = vld [vmem:[#allocation5 + $0x748] sm:$0xff]  ;;  %v1370_v34 = vpack.c.bf16 %v224_v29, %v220_v28  ;;  %1431 = vmatprep.subr.bf16.mxu0 %v1430_v26  ;;  %v351_v39 = vld [vmem:[#allocation5 + $0x760] sm:$0xff]  ;;  %v134_v28 = vld [vmem:[#allocation5 + $0x98] sm:$0xff] }
  0xa5   :  { %v352_v31 = vld [vmem:[#allocation5 + $0x768] sm:$0xff]  ;;  %1433 = vmatpush1.bf16.msra.mxu0 %v1432_v33  ;;  %v1436_v45 = vpack.c.bf16 %v351_v39, %v347_v37  ;;  %v227_v47 = vld [vmem:[#allocation5 + $0x380] sm:$0xff]  ;;  %v138_v29 = vld [vmem:[#allocation5 + $0xb8] sm:$0xff] }
  0xa6   :  { %v1434_v38 = vpack.c.bf16 %v352_v31, %v348_v30  ;;  %v228_v40 = vld [vmem:[#allocation5 + $0x388] sm:$0xff]  ;;  %1371 = vmatprep.subr.bf16.mxu1 %v1370_v34  ;;  %v231_v48 = vld [vmem:[#allocation5 + $0x3a0] sm:$0xff]  ;;  %v1498_v34 = vpack.c.bf16 %v138_v29, %v134_v28  ;;  %v137_v37 = vld [vmem:[#allocation5 + $0xb0] sm:$0xff] }
  0xa7   :  { %v232_v41 = vld [vmem:[#allocation5 + $0x3a8] sm:$0xff]  ;;  %v355_v49 = vld [vmem:[#allocation5 + $0x780] sm:$0xff]  ;;  %1373 = vmatpush1.bf16.msra.mxu1 %v1372_v44  ;;  %v1376_v56 = vpack.c.bf16 %v231_v48, %v227_v47  ;;  %v1500_v44 = vpack.c.bf16 %v137_v37, %v133_v36  ;;  %v153_v0 = vld [vmem:[#allocation5 + $0x130] sm:$0xff] }
  0xa8   :  { %v356_v42 = vld [vmem:[#allocation5 + $0x788] sm:$0xff]  ;;  %v1374_v46 = vpack.c.bf16 %v232_v41, %v228_v40  ;;  %1435 = vmatprep.subr.bf16.mxu0 %v1434_v38  ;;  %v359_v51 = vld [vmem:[#allocation5 + $0x7a0] sm:$0xff]  ;;  %v142_v40 = vld [vmem:[#allocation5 + $0xd8] sm:$0xff] }
  0xa9   :  { %v360_v43 = vld [vmem:[#allocation5 + $0x7a8] sm:$0xff]  ;;  %1437 = vmatpush1.bf16.msra.mxu0 %v1436_v45  ;;  %v1440_v57 = vpack.c.bf16 %v359_v51, %v355_v49  ;;  %v235_v59 = vld [vmem:[#allocation5 + $0x3c0] sm:$0xff]  ;;  %v146_v41 = vld [vmem:[#allocation5 + $0xf8] sm:$0xff] }
  0xaa   :  { %v1438_v50 = vpack.c.bf16 %v360_v43, %v356_v42  ;;  %v236_v52 = vld [vmem:[#allocation5 + $0x3c8] sm:$0xff]  ;;  %1375 = vmatprep.subr.bf16.mxu1 %v1374_v46  ;;  %v239_v60 = vld [vmem:[#allocation5 + $0x3e0] sm:$0xff]  ;;  %v1502_v48 = vpack.c.bf16 %v146_v41, %v142_v40  ;;  %v141_v49 = vld [vmem:[#allocation5 + $0xd0] sm:$0xff] }
  0xab   :  { %v240_v53 = vld [vmem:[#allocation5 + $0x3e8] sm:$0xff]  ;;  %v363_v61 = vld [vmem:[#allocation5 + $0x7c0] sm:$0xff]  ;;  %1377 = vmatpush1.bf16.msra.mxu1 %v1376_v56  ;;  %v1380_v4 = vpack.c.bf16 %v239_v60, %v235_v59  ;;  %v2120_v9 = vld [vmem:[#allocation3 + $0x38] sm:$0xff] }
  0xac   :  { %v364_v54 = vld [vmem:[#allocation5 + $0x7c8] sm:$0xff]  ;;  %v1378_v58 = vpack.c.bf16 %v240_v53, %v236_v52  ;;  %1439 = vmatprep.subr.bf16.mxu0 %v1438_v50  ;;  %v367_v63 = vld [vmem:[#allocation5 + $0x7e0] sm:$0xff]  ;;  %v145_v50 = vld [vmem:[#allocation5 + $0xf0] sm:$0xff] }
  0xad   :  { %v368_v55 = vld [vmem:[#allocation5 + $0x7e8] sm:$0xff]  ;;  %1441 = vmatpush1.bf16.msra.mxu0 %v1440_v57  ;;  %v1444_v5 = vpack.c.bf16 %v367_v63, %v363_v61  ;;  %v371_v7 = vld [vmem:[#allocation5 + $0x800] sm:$0xff]  ;;  %v1504_v59 = vpack.c.bf16 %v145_v50, %v141_v49  ;;  %v149_v63 = vld [vmem:[#allocation5 + $0x110] sm:$0xff] }
  0xae   :  { %v1442_v62 = vpack.c.bf16 %v368_v55, %v364_v54  ;;  %v372_v2 = vld [vmem:[#allocation5 + $0x808] sm:$0xff]  ;;  %1379 = vmatprep.subr.bf16.mxu1 %v1378_v58  ;;  %v375_v11 = vld [vmem:[#allocation5 + $0x820] sm:$0xff]  ;;  %v150_v54 = vld [vmem:[#allocation5 + $0x118] sm:$0xff] }
  0xaf   :  { %v376_v3 = vld [vmem:[#allocation5 + $0x828] sm:$0xff]  ;;  %1381 = vmatpush1.bf16.msra.mxu1 %v1380_v4  ;;  %v2104_v17 = vld [vmem:[#allocation3] sm:$0xff]  ;;  %v1448_v21 = vpack.c.bf16 %v375_v11, %v371_v7  ;;  %v154_v55 = vld [vmem:[#allocation5 + $0x138] sm:$0xff]  ;;  %v1508_v7 = vpack.c.bf16 %v153_v0, %v149_v63 }
  0xb0   :  { %1443 = vmatprep.subr.bf16.mxu0 %v1442_v62  ;;  %v1446_v10 = vpack.c.bf16 %v376_v3, %v372_v2  ;;  %v380_v14 = vld [vmem:[#allocation5 + $0x848] sm:$0xff]  ;;  %1491 = vmatprep.subr.bf16.mxu1 %v1490_v6  ;;  %v379_v23 = vld [vmem:[#allocation5 + $0x840] sm:$0xff]  ;;  %v1506_v61 = vpack.c.bf16 %v154_v55, %v150_v54  ;;  %v158_v3 = vld [vmem:[#allocation5 + $0x158] sm:$0xff] }
  0xb1   :  { %v384_v15 = vld [vmem:[#allocation5 + $0x868] sm:$0xff]  ;;  %1445 = vmatpush1.bf16.msra.mxu0 %v1444_v5  ;;  %v383_v27 = vld [vmem:[#allocation5 + $0x860] sm:$0xff]  ;;  %v162_v4 = vld [vmem:[#allocation5 + $0x178] sm:$0xff] }
  0xb2   :  { %1447 = vmatprep.subr.bf16.mxu0 %v1446_v10  ;;  %v1450_v26 = vpack.c.bf16 %v384_v15, %v380_v14  ;;  %570 = vmatmul.mubr.f32.vlgmr.msra.gmra.mrb[0].mxu1 %v2104_v17  ;;  %v388_v30 = vld [vmem:[#allocation5 + $0x888] sm:$0xff]  ;;  %v1452_v33 = vpack.c.bf16 %v383_v27, %v379_v23  ;;  %v387_v35 = vld [vmem:[#allocation5 + $0x880] sm:$0xff]  ;;  %v1510_v11 = vpack.c.bf16 %v162_v4, %v158_v3  ;;  %v157_v12 = vld [vmem:[#allocation5 + $0x150] sm:$0xff] }
  0xb3   :  { %v392_v31 = vld [vmem:[#allocation5 + $0x8a8] sm:$0xff]  ;;  %1493 = vmatpush1.bf16.msra.mxu1 %v1492_v20  ;;  %v391_v39 = vld [vmem:[#allocation5 + $0x8a0] sm:$0xff]  ;;  %v161_v13 = vld [vmem:[#allocation5 + $0x170] sm:$0xff]  ;;  %575 = vmatprep.mubr.f32.mxu1 %v2120_v9 }
  0xb4   :  { %647 = vmatmul.mubr.f32.vlgmr.msra.gmra.mrb[0].mxu0 %v2106_v18  ;;  %1495 = vmatprep.subr.bf16.mxu1 %v1494_v22  ;;  %v1454_v38 = vpack.c.bf16 %v392_v31, %v388_v30  ;;  %v396_v42 = vld [vmem:[#allocation5 + $0x8c8] sm:$0xff]  ;;  %v395_v45 = vld [vmem:[#allocation5 + $0x8c0] sm:$0xff]  ;;  %v1456_v47 = vpack.c.bf16 %v391_v39, %v387_v35  ;;  %v2122_v14 = vld [vmem:[#allocation3 + $0x30] sm:$0xff]  ;;  %v1512_v25 = vpack.c.bf16 %v161_v13, %v157_v12 }
  0xb5   :  { %1449 = vmatpush1.bf16.msra.mxu0 %v1448_v21  ;;  %v400_v43 = vld [vmem:[#allocation5 + $0x8e8] sm:$0xff]  ;;  %v2112_v51 = vld [vmem:[#allocation3 + $0x40] sm:$0xff]  ;;  %v166_v21 = vld [vmem:[#allocation5 + $0x198] sm:$0xff] }
  0xb6   :  { %1451 = vmatprep.subr.bf16.mxu0 %v1450_v26  ;;  %v2110_v46 = vld [vmem:[#allocation3 + $0x48] sm:$0xff]  ;;  %v1458_v52 = vpack.c.bf16 %v400_v43, %v396_v42  ;;  %v399_v53 = vld [vmem:[#allocation5 + $0x8e0] sm:$0xff]  ;;  %v170_v22 = vld [vmem:[#allocation5 + $0x1b8] sm:$0xff]  ;;  %576 = vmatmul.mubr.f32.gmra.mrb[2].mxu1 %v2122_v14 }
  0xb7   :  { %1497 = vmatpush1.bf16.msra.mxu1 %v1496_v32  ;;  %652 = vmatprep.mubr.f32.mxu0 %v2110_v46  ;;  %v404_v56 = vld [vmem:[#allocation5 + $0x908] sm:$0xff]  ;;  %v1460_v60 = vpack.c.bf16 %v399_v53, %v395_v45  ;;  %v403_v62 = vld [vmem:[#allocation5 + $0x900] sm:$0xff]  ;;  %v1514_v27 = vpack.c.bf16 %v170_v22, %v166_v21  ;;  %v165_v29 = vld [vmem:[#allocation5 + $0x190] sm:$0xff] }
  0xb8   :  { %1499 = vmatprep.subr.bf16.mxu1 %v1498_v34  ;;  %v408_v57 = vld [vmem:[#allocation5 + $0x928] sm:$0xff]  ;;  %653 = vmatmul.mubr.f32.gmra.mrb[2].mxu0 %v2112_v51  ;;  %v407_v2 = vld [vmem:[#allocation5 + $0x920] sm:$0xff]  ;;  %v169_v30 = vld [vmem:[#allocation5 + $0x1b0] sm:$0xff] }
  0xb9   :  { %1453 = vmatpush1.bf16.msra.mxu0 %v1452_v33  ;;  %v2116_v58 = vld [vmem:[#allocation3 + $0x28] sm:$0xff]  ;;  %v1462_v1 = vpack.c.bf16 %v408_v57, %v404_v56  ;;  %v411_v8 = vld [vmem:[#allocation5 + $0x940] sm:$0xff]  ;;  %v1464_v10 = vpack.c.bf16 %v407_v2, %v403_v62  ;;  %800 = vmatprep.mubr.f32.mxu1 %v2098_v16  ;;  %v174_v33 = vld [vmem:[#allocation5 + $0x1d8] sm:$0xff]  ;;  %v1516_v37 = vpack.c.bf16 %v169_v30, %v165_v29 }
  0xba   :  { %1455 = vmatprep.subr.bf16.mxu0 %v1454_v38  ;;  %1312 = vmatprep.mubr.msk.f32.mxu0 %vm485_vm0, %v2116_v58  ;;  %v412_v5 = vld [vmem:[#allocation5 + $0x948] sm:$0xff]  ;;  %v415_v20 = vld [vmem:[#allocation5 + $0x960] sm:$0xff]  ;;  %v178_v34 = vld [vmem:[#allocation5 + $0x1f8] sm:$0xff] }
  0xbb   :  { %1501 = vmatpush1.bf16.msra.mxu1 %v1500_v44  ;;  %v416_v6 = vld [vmem:[#allocation5 + $0x968] sm:$0xff]  ;;  %v1468_v26 = vpack.c.bf16 %v415_v20, %v411_v8  ;;  %v419_v28 = vld [vmem:[#allocation5 + $0x980] sm:$0xff]  ;;  %v1518_v16 = vpack.c.bf16 %v178_v34, %v174_v33  ;;  %v173_v40 = vld [vmem:[#allocation5 + $0x1d0] sm:$0xff] }
  0xbc   :  { %1503 = vmatprep.subr.bf16.mxu1 %v1502_v48  ;;  %v1466_v15 = vpack.c.bf16 %v416_v6, %v412_v5  ;;  %v420_v23 = vld [vmem:[#allocation5 + $0x988] sm:$0xff]  ;;  %v423_v32 = vld [vmem:[#allocation5 + $0x9a0] sm:$0xff]  ;;  %v177_v41 = vld [vmem:[#allocation5 + $0x1f0] sm:$0xff] }
  0xbd   :  { %1457 = vmatpush1.bf16.msra.mxu0 %v1456_v47  ;;  %v424_v24 = vld [vmem:[#allocation5 + $0x9a8] sm:$0xff]  ;;  %v1472_v38 = vpack.c.bf16 %v423_v32, %v419_v28  ;;  %v427_v39 = vld [vmem:[#allocation5 + $0x9c0] sm:$0xff]  ;;  %v182_v44 = vld [vmem:[#allocation5 + $0x218] sm:$0xff]  ;;  %v1520_v49 = vpack.c.bf16 %v177_v41, %v173_v40 }
  0xbe   :  { %1459 = vmatprep.subr.bf16.mxu0 %v1458_v52  ;;  %v1470_v31 = vpack.c.bf16 %v424_v24, %v420_v23  ;;  %v428_v35 = vld [vmem:[#allocation5 + $0x9c8] sm:$0xff]  ;;  %v431_v43 = vld [vmem:[#allocation5 + $0x9e0] sm:$0xff]  ;;  %v186_v45 = vld [vmem:[#allocation5 + $0x238] sm:$0xff] }
  0xbf   :  { %1505 = vmatpush1.bf16.msra.mxu1 %v1504_v59  ;;  %v432_v36 = vld [vmem:[#allocation5 + $0x9e8] sm:$0xff]  ;;  %v1476_v50 = vpack.c.bf16 %v431_v43, %v427_v39  ;;  %v1522_v52 = vpack.c.bf16 %v186_v45, %v182_v44  ;;  %v435_v53 = vld [vmem:[#allocation5 + $0xa00] sm:$0xff]  ;;  %v181_v54 = vld [vmem:[#allocation5 + $0x210] sm:$0xff] }
  0xc0   :  { %1507 = vmatprep.subr.bf16.mxu1 %v1506_v61  ;;  %v1474_v42 = vpack.c.bf16 %v432_v36, %v428_v35  ;;  %v436_v47 = vld [vmem:[#allocation5 + $0xa08] sm:$0xff]  ;;  %v185_v55 = vld [vmem:[#allocation5 + $0x230] sm:$0xff]  ;;  %v439_v57 = vld [vmem:[#allocation5 + $0xa20] sm:$0xff] }
  0xc1   :  { %1461 = vmatpush1.bf16.msra.mxu0 %v1460_v60  ;;  %v440_v48 = vld [vmem:[#allocation5 + $0xa28] sm:$0xff]  ;;  %v190_v59 = vld [vmem:[#allocation5 + $0x258] sm:$0xff]  ;;  %v1524_v63 = vpack.c.bf16 %v185_v55, %v181_v54  ;;  %v1480_v0 = vpack.c.bf16 %v439_v57, %v435_v53  ;;  %v443_v2 = vld [vmem:[#allocation5 + $0xa40] sm:$0xff] }
  0xc2   :  { %1463 = vmatprep.subr.bf16.mxu0 %v1462_v1  ;;  %v1478_v56 = vpack.c.bf16 %v440_v48, %v436_v47  ;;  %v194_v60 = vld [vmem:[#allocation5 + $0x278] sm:$0xff]  ;;  %v444_v61 = vld [vmem:[#allocation5 + $0xa48] sm:$0xff]  ;;  %v189_v3 = vld [vmem:[#allocation5 + $0x250] sm:$0xff] }
  0xc3   :  { %1509 = vmatpush1.bf16.msra.mxu1 %v1508_v7  ;;  %v448_v62 = vld [vmem:[#allocation5 + $0xa68] sm:$0xff]  ;;  %v1526_v1 = vpack.c.bf16 %v194_v60, %v190_v59  ;;  %v193_v4 = vld [vmem:[#allocation5 + $0x270] sm:$0xff]  ;;  %v447_v6 = vld [vmem:[#allocation5 + $0xa60] sm:$0xff] }
  0xc4   :  { %1511 = vmatprep.subr.bf16.mxu1 %v1510_v11  ;;  %v1482_v5 = vpack.c.bf16 %v448_v62, %v444_v61  ;;  %v198_v7 = vld [vmem:[#allocation5 + $0x298] sm:$0xff]  ;;  %v456_v11 = vld [vmem:[#allocation5 + $0xaa8] sm:$0xff]  ;;  %v1528_v12 = vpack.c.bf16 %v193_v4, %v189_v3  ;;  %v1484_v13 = vpack.c.bf16 %v447_v6, %v443_v2  ;;  %v451_v20 = vld [vmem:[#allocation5 + $0xa80] sm:$0xff] }
  0xc5   :  { %1465 = vmatpush1.bf16.msra.mxu0 %v1464_v10  ;;  %v202_v8 = vld [vmem:[#allocation5 + $0x2b8] sm:$0xff]  ;;  %v452_v10 = vld [vmem:[#allocation5 + $0xa88] sm:$0xff]  ;;  %v197_v21 = vld [vmem:[#allocation5 + $0x290] sm:$0xff] }
  0xc6   :  { %1467 = vmatprep.subr.bf16.mxu0 %v1466_v15  ;;  %v1530_v15 = vpack.c.bf16 %v202_v8, %v198_v7  ;;  %v201_v22 = vld [vmem:[#allocation5 + $0x2b0] sm:$0xff]  ;;  %v1486_v23 = vpack.c.bf16 %v456_v11, %v452_v10  ;;  %v455_v24 = vld [vmem:[#allocation5 + $0xaa0] sm:$0xff]  ;;  %v214_v32 = vld [vmem:[#allocation5 + $0x318] sm:$0xff] }
  0xc7   :  { %1513 = vmatpush1.bf16.msra.mxu1 %v1512_v25  ;;  %v206_v25 = vld [vmem:[#allocation5 + $0x2d8] sm:$0xff]  ;;  %v1488_v28 = vpack.c.bf16 %v455_v24, %v451_v20  ;;  %v205_v30 = vld [vmem:[#allocation5 + $0x2d0] sm:$0xff]  ;;  %v460_v34 = vld [vmem:[#allocation5 + $0xac8] sm:$0x3] }
  0xc8   :  { %1515 = vmatprep.subr.bf16.mxu1 %v1514_v27  ;;  %v1532_v27 = vpack.c.bf16 %v201_v22, %v197_v21  ;;  %v218_v33 = vld [vmem:[#allocation5 + $0x338] sm:$0xff]  ;;  %v2128_v41 = vld [vmem:[#allocation3 + $0x20] sm:$0xff]  ;;  %v221_v45 = vld [vmem:[#allocation5 + $0x350] sm:$0xff] }
  0xc9   :  { %1469 = vmatpush1.bf16.msra.mxu0 %v1468_v26  ;;  %v210_v26 = vld [vmem:[#allocation5 + $0x2f8] sm:$0xff]  ;;  %v1538_v36 = vpack.c.bf16 %v218_v33, %v214_v32  ;;  %v225_v47 = vld [vmem:[#allocation5 + $0x370] sm:$0xff]  ;;  %v975_v2 = vld [vmem:[#allocation8] sm:$0xff] }
  0xca   :  { %1471 = vmatprep.subr.bf16.mxu0 %v1470_v31  ;;  %v1534_v29 = vpack.c.bf16 %v210_v26, %v206_v25  ;;  %v209_v31 = vld [vmem:[#allocation5 + $0x2f0] sm:$0xff]  ;;  %v222_v39 = vld [vmem:[#allocation5 + $0x358] sm:$0xff]  ;;  %v979_v11 = vld [vmem:[#allocation8 + $0x20] sm:$0xff] }
  0xcb   :  { %1517 = vmatpush1.bf16.msra.mxu1 %v1516_v37  ;;  %v1536_v35 = vpack.c.bf16 %v209_v31, %v205_v30  ;;  %v213_v37 = vld [vmem:[#allocation5 + $0x310] sm:$0xff]  ;;  %v226_v40 = vld [vmem:[#allocation5 + $0x378] sm:$0xff] }
  0xcc   :  { %1519 = vmatprep.subr.bf16.mxu1 %v1518_v16  ;;  %v459_v16 = vld [vmem:[#allocation5 + $0xac0] sm:$0x3]  ;;  %v2130_v43 = vld [vmem:[#allocation3 + $0x58] sm:$0xff]  ;;  %v1542_v44 = vpack.c.bf16 %v226_v40, %v222_v39  ;;  %v229_v54 = vld [vmem:[#allocation5 + $0x390] sm:$0xff] }
  0xcd   :  { %1473 = vmatpush1.bf16.msra.mxu0 %v1472_v38  ;;  %v217_v38 = vld [vmem:[#allocation5 + $0x330] sm:$0xff]  ;;  %v230_v48 = vld [vmem:[#allocation5 + $0x398] sm:$0xff] }
  0xce   :  { %1475 = vmatprep.subr.bf16.mxu0 %v1474_v42  ;;  %v1540_v42 = vpack.c.bf16 %v217_v38, %v213_v37  ;;  %v233_v55 = vld [vmem:[#allocation5 + $0x3b0] sm:$0xff]  ;;  %v242_v57 = vld [vmem:[#allocation5 + $0x3f8] sm:$0xff] }
  0xcf   :  { %1521 = vmatpush1.bf16.msra.mxu1 %v1520_v49  ;;  %v234_v49 = vld [vmem:[#allocation5 + $0x3b8] sm:$0xff]  ;;  %v237_v59 = vld [vmem:[#allocation5 + $0x3d0] sm:$0xff]  ;;  %v1548_v61 = vpack.c.bf16 %v233_v55, %v229_v54 }
  0xd0   :  { %1523 = vmatprep.subr.bf16.mxu1 %v1522_v52  ;;  %v1544_v52 = vpack.c.bf16 %v225_v47, %v221_v45  ;;  %v1546_v53 = vpack.c.bf16 %v234_v49, %v230_v48  ;;  %v241_v60 = vld [vmem:[#allocation5 + $0x3f0] sm:$0xff]  ;;  %v246_v62 = vld [vmem:[#allocation5 + $0x418] sm:$0xff] }
  0xd1   :  { %1477 = vmatpush1.bf16.msra.mxu0 %v1476_v50  ;;  %v2136_v50 = vld [vmem:[#allocation3 + $0x50] sm:$0xff]  ;;  %v982_v7 = vld [vmem:[#allocation8 + $0x38] sm:$0xff]  ;;  %v1552_v20 = vpack.c.bf16 %v241_v60, %v237_v59 }
  0xd2   :  { %1479 = vmatprep.subr.bf16.mxu0 %v1478_v56  ;;  %v238_v56 = vld [vmem:[#allocation5 + $0x3d8] sm:$0xff]  ;;  %v980_v6 = vld [vmem:[#allocation8 + $0x28] sm:$0xff] }
  0xd3   :  { %1525 = vmatpush1.bf16.msra.mxu1 %v1524_v63  ;;  %v250_v63 = vld [vmem:[#allocation5 + $0x438] sm:$0xff]  ;;  %v1550_v3 = vpack.c.bf16 %v242_v57, %v238_v56  ;;  %v1666_v10 = vpack.c.bf16 %v982_v7, %v980_v6  ;;  %v249_v24 = vld [vmem:[#allocation5 + $0x430] sm:$0xff]  ;;  %v987_v7 = vld [vmem:[#allocation8 + $0x60] sm:$0xff] }
  0xd4   :  { %1527 = vmatprep.subr.bf16.mxu1 %v1526_v1  ;;  %v978_v1 = vld [vmem:[#allocation8 + $0x18] sm:$0xff]  ;;  %v1554_v22 = vpack.c.bf16 %v250_v63, %v246_v62  ;;  %v253_v32 = vld [vmem:[#allocation5 + $0x450] sm:$0xff] }
  0xd5   :  { %1481 = vmatpush1.bf16.msra.mxu0 %v1480_v0  ;;  %v976_v0 = vld [vmem:[#allocation8 + $0x8] sm:$0xff]  ;;  %v254_v25 = vld [vmem:[#allocation5 + $0x458] sm:$0xff] }
  0xd6   :  { %1483 = vmatprep.subr.bf16.mxu0 %v1482_v5  ;;  %v1662_v4 = vpack.c.bf16 %v978_v1, %v976_v0  ;;  %v977_v5 = vld [vmem:[#allocation8 + $0x10] sm:$0xff] }
  0xd7   :  { %1529 = vmatpush1.bf16.msra.mxu1 %v1528_v12  ;;  %v1664_v8 = vpack.c.bf16 %v977_v5, %v975_v2  ;;  %v981_v12 = vld [vmem:[#allocation8 + $0x30] sm:$0xff] }
  0xd8   :  { %1531 = vmatprep.subr.bf16.mxu1 %v1530_v15  ;;  %v986_v15 = vld [vmem:[#allocation8 + $0x58] sm:$0xff]  ;;  %v1668_v21 = vpack.c.bf16 %v981_v12, %v979_v11  ;;  %v257_v33 = vld [vmem:[#allocation5 + $0x470] sm:$0xff] }
  0xd9   :  { %1485 = vmatpush1.bf16.msra.mxu0 %v1484_v13  ;;  %v984_v13 = vld [vmem:[#allocation8 + $0x48] sm:$0xff]  ;;  %v1560_v37 = vpack.c.bf16 %v257_v33, %v253_v32  ;;  %v270_v40 = vld [vmem:[#allocation5 + $0x4d8] sm:$0xff] }
  0xda   :  { %1487 = vmatprep.subr.bf16.mxu0 %v1486_v23  ;;  %v245_v23 = vld [vmem:[#allocation5 + $0x410] sm:$0xff]  ;;  %v1670_v26 = vpack.c.bf16 %v986_v15, %v984_v13  ;;  %v278_v48 = vld [vmem:[#allocation5 + $0x518] sm:$0xff] }
  0xdb   :  { %1533 = vmatpush1.bf16.msra.mxu1 %v1532_v27  ;;  %v258_v27 = vld [vmem:[#allocation5 + $0x478] sm:$0xff]  ;;  %v1556_v30 = vpack.c.bf16 %v249_v24, %v245_v23  ;;  %v265_v39 = vld [vmem:[#allocation5 + $0x4b0] sm:$0xff] }
  0xdc   :  { %1535 = vmatprep.subr.bf16.mxu1 %v1534_v29  ;;  %v985_v29 = vld [vmem:[#allocation8 + $0x50] sm:$0xff]  ;;  %v1558_v31 = vpack.c.bf16 %v258_v27, %v254_v25  ;;  %v998_v27 = vld [vmem:[#allocation8 + $0xb8] sm:$0xff]  ;;  %v1000_v33 = vld [vmem:[#allocation8 + $0xc8] sm:$0xff] }
  0xdd   :  { %1489 = vmatpush1.bf16.msra.mxu0 %v1488_v28  ;;  %v983_v28 = vld [vmem:[#allocation8 + $0x40] sm:$0xff]  ;;  %v273_v47 = vld [vmem:[#allocation5 + $0x4f0] sm:$0xff]  ;;  %v282_v49 = vld [vmem:[#allocation5 + $0x538] sm:$0xff] }
  0xde   :  { %1310 = vmatprep.subr.msk.mxu0 %vm492_vm1, %v460_v34  ;;  %v1672_v34 = vpack.c.bf16 %v985_v29, %v983_v28  ;;  %v281_v54 = vld [vmem:[#allocation5 + $0x530] sm:$0xff]  ;;  %v286_v55 = vld [vmem:[#allocation5 + $0x558] sm:$0xff] }
  0xdf   :  { %1537 = vmatpush1.bf16.msra.mxu1 %v1536_v35  ;;  %v262_v35 = vld [vmem:[#allocation5 + $0x498] sm:$0xff]  ;;  %v285_v59 = vld [vmem:[#allocation5 + $0x550] sm:$0xff] }
  0xe0   :  { %1539 = vmatprep.subr.bf16.mxu1 %v1538_v36  ;;  %v266_v36 = vld [vmem:[#allocation5 + $0x4b8] sm:$0xff]  ;;  %v293_v63 = vld [vmem:[#allocation5 + $0x590] sm:$0xff] }
  0xe1   :  { %1311 = vmatpush1.msk.msra.mxu0 %vm492_vm1, %v459_v16  ;;  %v1562_v38 = vpack.c.bf16 %v266_v36, %v262_v35  ;;  %v261_v16 = vld [vmem:[#allocation5 + $0x490] sm:$0xff]  ;;  %v290_v56 = vld [vmem:[#allocation5 + $0x578] sm:$0xff] }
  0xe2   :  { %724 = vmatmul.mubr.f32.vlgmr.msra.gmra.mrb[0].mxu0 %v2128_v41  ;;  %1663 = vmatprep.subr.bf16.mxu0 %v1662_v4  ;;  %v1574_v57 = vpack.c.bf16 %v290_v56, %v286_v55  ;;  %v294_v60 = vld [vmem:[#allocation5 + $0x598] sm:$0xff]  ;;  %v297_v0 = vld [vmem:[#allocation5 + $0x5b0] sm:$0xff] }
  0xe3   :  { %1313 = vmatprep.mubr.msk.f32.mxu0 %vm485_vm0, %v2130_v43  ;;  %1541 = vmatpush1.bf16.msra.mxu1 %v1540_v42  ;;  %v274_v42 = vld [vmem:[#allocation5 + $0x4f8] sm:$0xff]  ;;  %v305_v11 = vld [vmem:[#allocation5 + $0x5f0] sm:$0xff]  ;;  %v1580_v13 = vpack.c.bf16 %v297_v0, %v293_v63 }
  0xe4   :  { %1543 = vmatprep.subr.bf16.mxu1 %v1542_v44  ;;  %1665 = vmatpush1.bf16.msra.mxu0 %v1664_v8  ;;  %v1564_v44 = vpack.c.bf16 %v265_v39, %v261_v16  ;;  %v1566_v45 = vpack.c.bf16 %v274_v42, %v270_v40  ;;  %v302_v2 = vld [vmem:[#allocation5 + $0x5d8] sm:$0xff]  ;;  %v329_v63 = vld [vmem:[#allocation5 + $0x6b0] sm:$0xff] }
  0xe5   :  { %1667 = vmatprep.subr.bf16.mxu0 %v1666_v10  ;;  %v990_v4 = vld [vmem:[#allocation8 + $0x78] sm:$0xff]  ;;  %v989_v8 = vld [vmem:[#allocation8 + $0x70] sm:$0xff] }
  0xe6   :  { %730 = vmatmul.mubr.f32.gmra.mrb[2].mxu0 %v2136_v50  ;;  %v306_v5 = vld [vmem:[#allocation5 + $0x5f8] sm:$0xff]  ;;  %v301_v10 = vld [vmem:[#allocation5 + $0x5d0] sm:$0xff]  ;;  %v1676_v12 = vpack.c.bf16 %v989_v8, %v987_v7 }
  0xe7   :  { %1545 = vmatpush1.bf16.msra.mxu1 %v1544_v52  ;;  %v1570_v52 = vpack.c.bf16 %v282_v49, %v278_v48  ;;  %v310_v15 = vld [vmem:[#allocation5 + $0x618] sm:$0xff]  ;;  %v1582_v23 = vpack.c.bf16 %v306_v5, %v302_v2  ;;  %v1584_v35 = vpack.c.bf16 %v305_v11, %v301_v10  ;;  %v333_v11 = vld [vmem:[#allocation5 + $0x6d0] sm:$0xff] }
  0xe8   :  { %1547 = vmatprep.subr.bf16.mxu1 %v1546_v53  ;;  %1669 = vmatpush1.bf16.msra.mxu0 %v1668_v21  ;;  %v277_v53 = vld [vmem:[#allocation5 + $0x510] sm:$0xff]  ;;  %v994_v21 = vld [vmem:[#allocation8 + $0x98] sm:$0xff] }
  0xe9   :  { %1671 = vmatprep.subr.bf16.mxu0 %v1670_v26  ;;  %v993_v25 = vld [vmem:[#allocation8 + $0x90] sm:$0xff]  ;;  %v996_v26 = vld [vmem:[#allocation8 + $0xa8] sm:$0xff]  ;;  %v1014_v7 = vld [vmem:[#allocation8 + $0x138] sm:$0xff] }
  0xea   :  { %v314_v28 = vld [vmem:[#allocation5 + $0x638] sm:$0xff] }
  0xeb   :  { %1549 = vmatpush1.bf16.msra.mxu1 %v1548_v61  ;;  %v298_v61 = vld [vmem:[#allocation5 + $0x5b8] sm:$0xff]  ;;  %v1586_v36 = vpack.c.bf16 %v314_v28, %v310_v15  ;;  %v341_v28 = vld [vmem:[#allocation5 + $0x710] sm:$0xff] }
  0xec   :  { %1551 = vmatprep.subr.bf16.mxu1 %v1550_v3  ;;  %1673 = vmatpush1.bf16.msra.mxu0 %v1672_v34  ;;  %v1578_v1 = vpack.c.bf16 %v298_v61, %v294_v60  ;;  %v988_v3 = vld [vmem:[#allocation8 + $0x68] sm:$0xff]  ;;  %v997_v32 = vld [vmem:[#allocation8 + $0xb0] sm:$0xff]  ;;  %v1002_v34 = vld [vmem:[#allocation8 + $0xd8] sm:$0xff] }
  0xed   :  { %v1674_v6 = vpack.c.bf16 %v990_v4, %v988_v3  ;;  %v318_v16 = vld [vmem:[#allocation5 + $0x658] sm:$0xff]  ;;  %v1686_v42 = vpack.c.bf16 %v1002_v34, %v1000_v33  ;;  %v1007_v4 = vld [vmem:[#allocation8 + $0x100] sm:$0xff] }
  0xee   :  { %v322_v40 = vld [vmem:[#allocation5 + $0x678] sm:$0xff]  ;;  %v1015_v34 = vld [vmem:[#allocation8 + $0x140] sm:$0xff] }
  0xef   :  { %1553 = vmatpush1.bf16.msra.mxu1 %v1552_v20  ;;  %1675 = vmatprep.subr.bf16.mxu0 %v1674_v6  ;;  %v992_v20 = vld [vmem:[#allocation8 + $0x88] sm:$0xff]  ;;  %v1590_v49 = vpack.c.bf16 %v322_v40, %v318_v16  ;;  %v330_v55 = vld [vmem:[#allocation5 + $0x6b8] sm:$0xff] }
  0xf0   :  { %1555 = vmatprep.subr.bf16.mxu1 %v1554_v22  ;;  %v991_v22 = vld [vmem:[#allocation8 + $0x80] sm:$0xff]  ;;  %1677 = vmatpush1.bf16.msra.mxu0 %v1676_v12  ;;  %v1678_v24 = vpack.c.bf16 %v994_v21, %v992_v20  ;;  %v334_v0 = vld [vmem:[#allocation5 + $0x6d8] sm:$0xff]  ;;  %v1012_v6 = vld [vmem:[#allocation8 + $0x128] sm:$0xff] }
  0xf1   :  { %v1680_v29 = vpack.c.bf16 %v993_v25, %v991_v22  ;;  %v338_v2 = vld [vmem:[#allocation5 + $0x6f8] sm:$0xff]  ;;  %v337_v12 = vld [vmem:[#allocation5 + $0x6f0] sm:$0xff]  ;;  %v1698_v21 = vpack.c.bf16 %v1014_v7, %v1012_v6  ;;  %v1011_v22 = vld [vmem:[#allocation8 + $0x120] sm:$0xff] }
  0xf2   :  { %801 = vmatmul.mubr.f32.vlgmr.msra.gmra.mrb[4].mxu1 %v2104_v17  ;;  %v269_v17 = vld [vmem:[#allocation5 + $0x4d0] sm:$0xff]  ;;  %1679 = vmatprep.subr.bf16.mxu0 %v1678_v24  ;;  %v1598_v10 = vpack.c.bf16 %v338_v2, %v334_v0  ;;  %v346_v20 = vld [vmem:[#allocation5 + $0x738] sm:$0xff]  ;;  %v1027_v7 = vld [vmem:[#allocation8 + $0x1a0] sm:$0xff] }
  0xf3   :  { %1557 = vmatpush1.bf16.msra.mxu1 %v1556_v30  ;;  %806 = vmatprep.mubr.f32.mxu1 %v2120_v9  ;;  %v1568_v9 = vpack.c.bf16 %v273_v47, %v269_v17  ;;  %v1682_v30 = vpack.c.bf16 %v998_v27, %v996_v26  ;;  %v1004_v17 = vld [vmem:[#allocation8 + $0xe8] sm:$0xff]  ;;  %v1006_v47 = vld [vmem:[#allocation8 + $0xf8] sm:$0xff]  ;;  %v1009_v5 = vld [vmem:[#allocation8 + $0x110] sm:$0xff]  ;;  %v1600_v26 = vpack.c.bf16 %v337_v12, %v333_v11 }
  0xf4   :  { %1559 = vmatprep.subr.bf16.mxu1 %v1558_v31  ;;  %v995_v31 = vld [vmem:[#allocation8 + $0xa0] sm:$0xff]  ;;  %1681 = vmatpush1.bf16.msra.mxu0 %v1680_v29  ;;  %v1690_v56 = vpack.c.bf16 %v1006_v47, %v1004_v17  ;;  %v1696_v15 = vpack.c.bf16 %v1009_v5, %v1007_v4  ;;  %v1016_v24 = vld [vmem:[#allocation8 + $0x148] sm:$0xff]  ;;  %v1018_v25 = vld [vmem:[#allocation8 + $0x158] sm:$0xff] }
  0xf5   :  { %v1684_v39 = vpack.c.bf16 %v997_v32, %v995_v31  ;;  %1683 = vmatprep.subr.bf16.mxu0 %v1682_v30  ;;  %v345_v29 = vld [vmem:[#allocation5 + $0x730] sm:$0xff]  ;;  %v350_v30 = vld [vmem:[#allocation5 + $0x758] sm:$0xff]  ;;  %v1702_v33 = vpack.c.bf16 %v1018_v25, %v1016_v24  ;;  %v1019_v47 = vld [vmem:[#allocation8 + $0x160] sm:$0xff] }
  0xf6   :  { %807 = vmatmul.mubr.f32.gmra.mrb[6].mxu1 %v2122_v14  ;;  %v1572_v14 = vpack.c.bf16 %v281_v54, %v277_v53  ;;  %v326_v53 = vld [vmem:[#allocation5 + $0x698] sm:$0xff]  ;;  %v353_v40 = vld [vmem:[#allocation5 + $0x770] sm:$0xff] }
  0xf7   :  { %1561 = vmatpush1.bf16.msra.mxu1 %v1560_v37  ;;  %877 = vmatprep.mubr.f32.mxu1 %v2101_v19  ;;  %v289_v19 = vld [vmem:[#allocation5 + $0x570] sm:$0xff]  ;;  %v1594_v61 = vpack.c.bf16 %v330_v55, %v326_v53  ;;  %v354_v32 = vld [vmem:[#allocation5 + $0x778] sm:$0xff] }
  0xf8   :  { %1563 = vmatprep.subr.bf16.mxu1 %v1562_v38  ;;  %v1576_v62 = vpack.c.bf16 %v289_v19, %v285_v59  ;;  %v309_v37 = vld [vmem:[#allocation5 + $0x610] sm:$0xff]  ;;  %1685 = vmatpush1.bf16.msra.mxu0 %v1684_v39  ;;  %v1010_v19 = vld [vmem:[#allocation8 + $0x118] sm:$0xff]  ;;  %v1606_v16 = vpack.c.bf16 %v354_v32, %v350_v30 }
  0xf9   :  { %v313_v38 = vld [vmem:[#allocation5 + $0x630] sm:$0xff]  ;;  %1687 = vmatprep.subr.bf16.mxu0 %v1686_v42  ;;  %v358_v42 = vld [vmem:[#allocation5 + $0x798] sm:$0xff] }
  0xfa   :  { %v1588_v48 = vpack.c.bf16 %v313_v38, %v309_v37  ;;  %v1008_v59 = vld [vmem:[#allocation8 + $0x108] sm:$0xff]  ;;  %v1022_v37 = vld [vmem:[#allocation8 + $0x178] sm:$0xff]  ;;  %v1604_v38 = vpack.c.bf16 %v345_v29, %v341_v28  ;;  %v1033_v32 = vld [vmem:[#allocation8 + $0x1d0] sm:$0xff] }
  0xfb   :  { %1565 = vmatpush1.bf16.msra.mxu1 %v1564_v44  ;;  %v999_v44 = vld [vmem:[#allocation8 + $0xc0] sm:$0xff]  ;;  %v1694_v3 = vpack.c.bf16 %v1010_v19, %v1008_v59  ;;  %v349_v39 = vld [vmem:[#allocation5 + $0x750] sm:$0xff]  ;;  %v378_v5 = vld [vmem:[#allocation5 + $0x838] sm:$0xff] }
  0xfc   :  { %1567 = vmatprep.subr.bf16.mxu1 %v1566_v45  ;;  %v1001_v45 = vld [vmem:[#allocation8 + $0xd0] sm:$0xff]  ;;  %v1023_v19 = vld [vmem:[#allocation8 + $0x180] sm:$0xff]  ;;  %v1034_v11 = vld [vmem:[#allocation8 + $0x1d8] sm:$0xff] }
  0xfd   :  { %v1688_v54 = vpack.c.bf16 %v1001_v45, %v999_v44  ;;  %v362_v45 = vld [vmem:[#allocation5 + $0x7b8] sm:$0xff]  ;;  %v361_v55 = vld [vmem:[#allocation5 + $0x7b0] sm:$0xff] }
  0xfe   :  { %v1610_v53 = vpack.c.bf16 %v362_v45, %v358_v42  ;;  %v369_v2 = vld [vmem:[#allocation5 + $0x7f0] sm:$0xff]  ;;  %v390_v29 = vld [vmem:[#allocation5 + $0x898] sm:$0xff] }
  0xff   :  { %1569 = vmatpush1.bf16.msra.mxu1 %v1568_v9  ;;  %v317_v9 = vld [vmem:[#allocation5 + $0x650] sm:$0xff]  ;;  %1689 = vmatpush1.bf16.msra.mxu0 %v1688_v54  ;;  %v394_v30 = vld [vmem:[#allocation5 + $0x8b8] sm:$0xff] }
 0x100   :  { %1571 = vmatprep.subr.bf16.mxu1 %v1570_v52  ;;  %v321_v52 = vld [vmem:[#allocation5 + $0x670] sm:$0xff]  ;;  %1691 = vmatprep.subr.bf16.mxu0 %v1690_v56  ;;  %v366_v56 = vld [vmem:[#allocation5 + $0x7d8] sm:$0xff] }
 0x101   :  { %v1592_v60 = vpack.c.bf16 %v321_v52, %v317_v9  ;;  %v1026_v9 = vld [vmem:[#allocation8 + $0x198] sm:$0xff]  ;;  %v1608_v52 = vpack.c.bf16 %v353_v40, %v349_v39  ;;  %v357_v54 = vld [vmem:[#allocation5 + $0x790] sm:$0xff] }
 0x102   :  { %v385_v28 = vld [vmem:[#allocation5 + $0x870] sm:$0xff]  ;;  %v1038_v39 = vld [vmem:[#allocation8 + $0x1f8] sm:$0xff] }
 0x103   :  { %1573 = vmatpush1.bf16.msra.mxu1 %v1572_v14  ;;  %v1003_v14 = vld [vmem:[#allocation8 + $0xe0] sm:$0xff]  ;;  %v402_v40 = vld [vmem:[#allocation5 + $0x8f8] sm:$0xff] }
 0x104   :  { %1575 = vmatprep.subr.bf16.mxu1 %v1574_v57  ;;  %v1005_v57 = vld [vmem:[#allocation8 + $0xf0] sm:$0xff] }
 0x105   :  { %v1037_v45 = vld [vmem:[#allocation8 + $0x1f0] sm:$0xff] }
 0x107   :  { %1577 = vmatpush1.bf16.msra.mxu1 %v1576_v62  ;;  %v325_v62 = vld [vmem:[#allocation5 + $0x690] sm:$0xff] }
 0x108   :  { %1579 = vmatprep.subr.bf16.mxu1 %v1578_v1  ;;  %v1692_v1 = vpack.c.bf16 %v1005_v57, %v1003_v14  ;;  %v1596_v8 = vpack.c.bf16 %v329_v63, %v325_v62  ;;  %v370_v57 = vld [vmem:[#allocation5 + $0x7f8] sm:$0xff]  ;;  %v1612_v63 = vpack.c.bf16 %v361_v55, %v357_v54  ;;  %v405_v54 = vld [vmem:[#allocation5 + $0x910] sm:$0xff] }
 0x109   :  { %v1030_v62 = vld [vmem:[#allocation8 + $0x1b8] sm:$0xff]  ;;  %v1614_v0 = vpack.c.bf16 %v370_v57, %v366_v56  ;;  %v1040_v57 = vld [vmem:[#allocation8 + $0x208] sm:$0xff] }
 0x10a   :  { %1693 = vmatpush1.bf16.msra.mxu0 %v1692_v1  ;;  %v365_v1 = vld [vmem:[#allocation5 + $0x7d0] sm:$0xff]  ;;  %v414_v55 = vld [vmem:[#allocation5 + $0x958] sm:$0xff] }
 0x10b   :  { %1581 = vmatpush1.bf16.msra.mxu1 %v1580_v13  ;;  %v342_v13 = vld [vmem:[#allocation5 + $0x718] sm:$0xff]  ;;  %1695 = vmatprep.subr.bf16.mxu0 %v1694_v3  ;;  %v1616_v12 = vpack.c.bf16 %v369_v2, %v365_v1  ;;  %v421_v2 = vld [vmem:[#allocation5 + $0x990] sm:$0xff] }
 0x10c   :  { %1583 = vmatprep.subr.bf16.mxu1 %v1582_v23  ;;  %v1013_v23 = vld [vmem:[#allocation8 + $0x130] sm:$0xff]  ;;  %v1602_v27 = vpack.c.bf16 %v346_v20, %v342_v13 }
 0x10d   :  { %v1700_v31 = vpack.c.bf16 %v1013_v23, %v1011_v22  ;;  %v374_v3 = vld [vmem:[#allocation5 + $0x818] sm:$0xff]  ;;  %v377_v20 = vld [vmem:[#allocation5 + $0x830] sm:$0xff] }
 0x10e   :  { %1697 = vmatpush1.bf16.msra.mxu0 %v1696_v15  ;;  %v1618_v13 = vpack.c.bf16 %v378_v5, %v374_v3  ;;  %v373_v15 = vld [vmem:[#allocation5 + $0x810] sm:$0xff]  ;;  %v382_v22 = vld [vmem:[#allocation5 + $0x858] sm:$0xff] }
 0x10f   :  { %1585 = vmatpush1.bf16.msra.mxu1 %v1584_v35  ;;  %1699 = vmatprep.subr.bf16.mxu0 %v1698_v21  ;;  %v1017_v35 = vld [vmem:[#allocation8 + $0x150] sm:$0xff]  ;;  %v1620_v25 = vpack.c.bf16 %v377_v20, %v373_v15 }
 0x110   :  { %1587 = vmatprep.subr.bf16.mxu1 %v1586_v36  ;;  %v1020_v36 = vld [vmem:[#allocation8 + $0x168] sm:$0xff]  ;;  %v1704_v44 = vpack.c.bf16 %v1017_v35, %v1015_v34  ;;  %v386_v23 = vld [vmem:[#allocation5 + $0x878] sm:$0xff] }
 0x111   :  { %v1706_v17 = vpack.c.bf16 %v1022_v37, %v1020_v36  ;;  %v389_v35 = vld [vmem:[#allocation5 + $0x890] sm:$0xff]  ;;  %v1626_v37 = vpack.c.bf16 %v394_v30, %v390_v29  ;;  %v418_v56 = vld [vmem:[#allocation5 + $0x978] sm:$0xff] }
 0x112   :  { %1701 = vmatpush1.bf16.msra.mxu0 %v1700_v31  ;;  %v1031_v31 = vld [vmem:[#allocation8 + $0x1c0] sm:$0xff]  ;;  %v393_v36 = vld [vmem:[#allocation5 + $0x8b0] sm:$0xff]  ;;  %v434_v5 = vld [vmem:[#allocation5 + $0x9f8] sm:$0xff] }
 0x113   :  { %1589 = vmatpush1.bf16.msra.mxu1 %v1588_v48  ;;  %1703 = vmatprep.subr.bf16.mxu0 %v1702_v33  ;;  %v1021_v48 = vld [vmem:[#allocation8 + $0x170] sm:$0xff]  ;;  %v1720_v33 = vpack.c.bf16 %v1033_v32, %v1031_v31 }
 0x114   :  { %1591 = vmatprep.subr.bf16.mxu1 %v1590_v49  ;;  %v1024_v49 = vld [vmem:[#allocation8 + $0x188] sm:$0xff]  ;;  %v1708_v14 = vpack.c.bf16 %v1021_v48, %v1019_v47  ;;  %v458_v29 = vld [vmem:[#allocation5 + $0xab8] sm:$0xff] }
 0x115   :  { %v1710_v59 = vpack.c.bf16 %v1026_v9, %v1024_v49  ;;  %v397_v47 = vld [vmem:[#allocation5 + $0x8d0] sm:$0xff]  ;;  %v406_v49 = vld [vmem:[#allocation5 + $0x918] sm:$0xff] }
 0x116   :  { %1705 = vmatpush1.bf16.msra.mxu0 %v1704_v44  ;;  %v1035_v44 = vld [vmem:[#allocation8 + $0x1e0] sm:$0xff]  ;;  %v401_v48 = vld [vmem:[#allocation5 + $0x8f0] sm:$0xff]  ;;  %v410_v9 = vld [vmem:[#allocation5 + $0x938] sm:$0xff] }
 0x117   :  { %1593 = vmatpush1.bf16.msra.mxu1 %v1592_v60  ;;  %1707 = vmatprep.subr.bf16.mxu0 %v1706_v17  ;;  %v1025_v60 = vld [vmem:[#allocation8 + $0x190] sm:$0xff]  ;;  %v1628_v17 = vpack.c.bf16 %v393_v36, %v389_v35  ;;  %v461_v36 = vld [vmem:[#allocation5 + $0xad0] sm:$0x3] }
 0x118   :  { %1595 = vmatprep.subr.bf16.mxu1 %v1594_v61  ;;  %v1028_v61 = vld [vmem:[#allocation8 + $0x1a8] sm:$0xff]  ;;  %v1712_v4 = vpack.c.bf16 %v1025_v60, %v1023_v19  ;;  %v462_v35 = vld [vmem:[#allocation5 + $0xad8] sm:$0x3] }
 0x119   :  { %v1714_v6 = vpack.c.bf16 %v1030_v62, %v1028_v61  ;;  %v413_v19 = vld [vmem:[#allocation5 + $0x950] sm:$0xff]  ;;  %v422_v62 = vld [vmem:[#allocation5 + $0x998] sm:$0xff] }
 0x11a   :  { %1709 = vmatpush1.bf16.msra.mxu0 %v1708_v14  ;;  %v417_v60 = vld [vmem:[#allocation5 + $0x970] sm:$0xff] }
 0x11b   :  { %1597 = vmatpush1.bf16.msra.mxu1 %v1596_v8  ;;  %1711 = vmatprep.subr.bf16.mxu0 %v1710_v59  ;;  %v1029_v8 = vld [vmem:[#allocation8 + $0x1b0] sm:$0xff]  ;;  %v1638_v59 = vpack.c.bf16 %v418_v56, %v414_v55  ;;  %v1046_v55 = vld [vmem:[#allocation8 + $0x238] sm:$0xff] }
 0x11c   :  { %1599 = vmatprep.subr.bf16.mxu1 %v1598_v10  ;;  %v1032_v10 = vld [vmem:[#allocation8 + $0x1c8] sm:$0xff]  ;;  %v1716_v21 = vpack.c.bf16 %v1029_v8, %v1027_v7 }
 0x11d   :  { %v1718_v24 = vpack.c.bf16 %v1034_v11, %v1032_v10  ;;  %v425_v3 = vld [vmem:[#allocation5 + $0x9b0] sm:$0xff]  ;;  %v438_v11 = vld [vmem:[#allocation5 + $0xa18] sm:$0xff] }
 0x11e   :  { %1713 = vmatpush1.bf16.msra.mxu0 %v1712_v4  ;;  %v430_v4 = vld [vmem:[#allocation5 + $0x9d8] sm:$0xff]  ;;  %v429_v8 = vld [vmem:[#allocation5 + $0x9d0] sm:$0xff] }
 0x11f   :  { %1601 = vmatpush1.bf16.msra.mxu1 %v1600_v26  ;;  %1715 = vmatprep.subr.bf16.mxu0 %v1714_v6  ;;  %v1622_v26 = vpack.c.bf16 %v386_v23, %v382_v22  ;;  %v1644_v6 = vpack.c.bf16 %v425_v3, %v421_v2  ;;  %v1646_v7 = vpack.c.bf16 %v434_v5, %v430_v4  ;;  %v433_v10 = vld [vmem:[#allocation5 + $0x9f0] sm:$0xff]  ;;  %v446_v22 = vld [vmem:[#allocation5 + $0xa58] sm:$0xff] }
 0x120   :  { %1603 = vmatprep.subr.bf16.mxu1 %v1602_v27  ;;  %v381_v27 = vld [vmem:[#allocation5 + $0x850] sm:$0xff]  ;;  %v450_v23 = vld [vmem:[#allocation5 + $0xa78] sm:$0xff] }
 0x121   :  { %v1624_v34 = vpack.c.bf16 %v385_v28, %v381_v27  ;;  %v437_v20 = vld [vmem:[#allocation5 + $0xa10] sm:$0xff]  ;;  %v454_v28 = vld [vmem:[#allocation5 + $0xa98] sm:$0xff] }
 0x122   :  { %1717 = vmatpush1.bf16.msra.mxu0 %v1716_v21  ;;  %v441_v21 = vld [vmem:[#allocation5 + $0xa30] sm:$0xff]  ;;  %v1658_v31 = vpack.c.bf16 %v458_v29, %v454_v28 }
 0x123   :  { %1605 = vmatpush1.bf16.msra.mxu1 %v1604_v38  ;;  %1719 = vmatprep.subr.bf16.mxu0 %v1718_v24  ;;  %v398_v38 = vld [vmem:[#allocation5 + $0x8d8] sm:$0xff]  ;;  %v1652_v24 = vpack.c.bf16 %v441_v21, %v437_v20  ;;  %v449_v27 = vld [vmem:[#allocation5 + $0xa70] sm:$0xff] }
 0x124   :  { %1607 = vmatprep.subr.bf16.mxu1 %v1606_v16  ;;  %v1036_v16 = vld [vmem:[#allocation8 + $0x1e8] sm:$0xff]  ;;  %v1058_v21 = vld [vmem:[#allocation8 + $0x298] sm:$0xff] }
 0x125   :  { %v1722_v42 = vpack.c.bf16 %v1038_v39, %v1036_v16  ;;  %v453_v32 = vld [vmem:[#allocation5 + $0xa90] sm:$0xff] }
 0x126   :  { %1721 = vmatpush1.bf16.msra.mxu0 %v1720_v33  ;;  %v457_v33 = vld [vmem:[#allocation5 + $0xab0] sm:$0xff] }
 0x127   :  { %1609 = vmatpush1.bf16.msra.mxu1 %v1608_v52  ;;  %1723 = vmatprep.subr.bf16.mxu0 %v1722_v42  ;;  %v1632_v52 = vpack.c.bf16 %v401_v48, %v397_v47  ;;  %v1056_v20 = vld [vmem:[#allocation8 + $0x288] sm:$0xff] }
 0x128   :  { %1611 = vmatprep.subr.bf16.mxu1 %v1610_v53  ;;  %v1634_v53 = vpack.c.bf16 %v410_v9, %v406_v49  ;;  %v1039_v9 = vld [vmem:[#allocation8 + $0x200] sm:$0xff] }
 0x12b   :  { %1613 = vmatpush1.bf16.msra.mxu1 %v1612_v63  ;;  %v426_v63 = vld [vmem:[#allocation5 + $0x9b8] sm:$0xff] }
 0x12c   :  { %1615 = vmatprep.subr.bf16.mxu1 %v1614_v0  ;;  %v1640_v0 = vpack.c.bf16 %v417_v60, %v413_v19  ;;  %v1642_v1 = vpack.c.bf16 %v426_v63, %v422_v62  ;;  %v1045_v62 = vld [vmem:[#allocation8 + $0x230] sm:$0xff] }
 0x12f   :  { %1617 = vmatpush1.bf16.msra.mxu1 %v1616_v12  ;;  %v442_v12 = vld [vmem:[#allocation5 + $0xa38] sm:$0xff] }
 0x130   :  { %1619 = vmatprep.subr.bf16.mxu1 %v1618_v13  ;;  %v1648_v13 = vpack.c.bf16 %v433_v10, %v429_v8  ;;  %v1650_v15 = vpack.c.bf16 %v442_v12, %v438_v11  ;;  %v1052_v8 = vld [vmem:[#allocation8 + $0x268] sm:$0xff]  ;;  %v1054_v10 = vld [vmem:[#allocation8 + $0x278] sm:$0xff] }
 0x131   :  { %v1738_v12 = vpack.c.bf16 %v1054_v10, %v1052_v8  ;;  %v1092_v8 = vld [vmem:[#allocation8 + $0x3a8] sm:$0xff]  ;;  %v1094_v10 = vld [vmem:[#allocation8 + $0x3b8] sm:$0xff] }
 0x132   :  { %878 = vmatmul.mubr.f32.vlgmr.msra.gmra.mrb[4].mxu1 %v2106_v18  ;;  %v1724_v18 = vpack.c.bf16 %v1037_v45, %v1035_v44  ;;  %v2159_v45 = vld [vmem:[#allocation7] sm:$0xf] }
 0x133   :  { %1621 = vmatpush1.bf16.msra.mxu1 %v1620_v25  ;;  %883 = vmatprep.mubr.f32.mxu1 %v2110_v46  ;;  %v1630_v46 = vpack.c.bf16 %v402_v40, %v398_v38  ;;  %v1654_v25 = vpack.c.bf16 %v450_v23, %v446_v22  ;;  %v465_v40 = vlaneseq  ;;  %v1742_v23 = vpack.c.bf16 %v1058_v21, %v1056_v20  ;;  %v1096_v20 = vld [vmem:[#allocation8 + $0x3c8] sm:$0xff]  ;;  %v1098_v21 = vld [vmem:[#allocation8 + $0x3d8] sm:$0xff] }
 0x134   :  { %1623 = vmatprep.subr.bf16.mxu1 %v1622_v26  ;;  %1725 = vmatpush1.bf16.msra.mxu0 %v1724_v18  ;;  %v445_v26 = vld [vmem:[#allocation5 + $0xa50] sm:$0xff] }
 0x135   :  { %v1656_v30 = vpack.c.bf16 %v449_v27, %v445_v26  ;;  %v2154_v42 = vshrl.u32 %v465_v40, 7  ;;  %v1060_v26 = vld [vmem:[#allocation8 + $0x2a8] sm:$0xff]  ;;  %v1062_v27 = vld [vmem:[#allocation8 + $0x2b8] sm:$0xff] }
 0x136   :  { %884 = vmatmul.mubr.f32.gmra.mrb[6].mxu1 %v2112_v51  ;;  %v409_v51 = vld [vmem:[#allocation5 + $0x930] sm:$0xff]  ;;  %v1746_v29 = vpack.c.bf16 %v1062_v27, %v1060_v26  ;;  %v1102_v27 = vld [vmem:[#allocation8 + $0x3f8] sm:$0xff] }
 0x137   :  { %1625 = vmatpush1.bf16.msra.mxu1 %v1624_v34  ;;  %1316 = vmatprep.mubr.msk.f32.mxu1 %vm485_vm0, %v2116_v58  ;;  %v1636_v14 = vpack.c.bf16 %v409_v51, %v405_v54  ;;  %v1042_v58 = vld [vmem:[#allocation8 + $0x218] sm:$0xff]  ;;  %v1660_v34 = vpack.c.bf16 %v457_v33, %v453_v32  ;;  %v2157_v44 = vsub.s32 0, %v2154_v42  ;;  %v2162_v18 = vsub.s32 1, %v2154_v42  ;;  %v1044_v51 = vld [vmem:[#allocation8 + $0x228] sm:$0xff] }
 0x138   :  { %1627 = vmatprep.subr.bf16.mxu1 %v1626_v37  ;;  %v1726_v61 = vpack.c.bf16 %v1042_v58, %v1040_v57  ;;  %v1730_v60 = vpack.c.bf16 %v1046_v55, %v1044_v51  ;;  %v1064_v32 = vld [vmem:[#allocation8 + $0x2c8] sm:$0xff]  ;;  %v1066_v33 = vld [vmem:[#allocation8 + $0x2d8] sm:$0xff]  ;;  %v1075_v51 = vld [vmem:[#allocation8 + $0x320] sm:$0xff] }
 0x139   :  { %v1077_v55 = vld [vmem:[#allocation8 + $0x330] sm:$0xff]  ;;  %v1100_v26 = vld [vmem:[#allocation8 + $0x3e8] sm:$0xff] }
 0x13a   :  { %1727 = vmatprep.subr.bf16.mxu0 %v1726_v61  ;;  %v1043_v61 = vld [vmem:[#allocation8 + $0x220] sm:$0xff] }
 0x13b   :  { %1629 = vmatpush1.bf16.msra.mxu1 %v1628_v17  ;;  %v1732_v4 = vpack.c.bf16 %v1045_v62, %v1043_v61  ;;  %v1086_v61 = vld [vmem:[#allocation8 + $0x378] sm:$0xff] }
 0x13c   :  { %1631 = vmatprep.subr.bf16.mxu1 %v1630_v46 }
 0x13f   :  { %1633 = vmatpush1.bf16.msra.mxu1 %v1632_v52  ;;  %v1041_v52 = vld [vmem:[#allocation8 + $0x210] sm:$0xff] }
 0x140   :  { %1635 = vmatprep.subr.bf16.mxu1 %v1634_v53  ;;  %v1728_v57 = vpack.c.bf16 %v1041_v52, %v1039_v9  ;;  %v1076_v9 = vld [vmem:[#allocation8 + $0x328] sm:$0xff]  ;;  %v1078_v52 = vld [vmem:[#allocation8 + $0x338] sm:$0xff] }
 0x143   :  { %1637 = vmatpush1.bf16.msra.mxu1 %v1636_v14 }
 0x144   :  { %1639 = vmatprep.subr.bf16.mxu1 %v1638_v59 }
 0x147   :  { %1641 = vmatpush1.bf16.msra.mxu1 %v1640_v0  ;;  %v1048_v0 = vld [vmem:[#allocation8 + $0x248] sm:$0xff] }
 0x148   :  { %1643 = vmatprep.subr.bf16.mxu1 %v1642_v1  ;;  %v1050_v1 = vld [vmem:[#allocation8 + $0x258] sm:$0xff] }
 0x149   :  { %v1734_v5 = vpack.c.bf16 %v1050_v1, %v1048_v0  ;;  %v1083_v0 = vld [vmem:[#allocation8 + $0x360] sm:$0xff]  ;;  %v1085_v1 = vld [vmem:[#allocation8 + $0x370] sm:$0xff] }
 0x14b   :  { %1645 = vmatpush1.bf16.msra.mxu1 %v1644_v6  ;;  %v1047_v6 = vld [vmem:[#allocation8 + $0x240] sm:$0xff] }
 0x14c   :  { %1647 = vmatprep.subr.bf16.mxu1 %v1646_v7  ;;  %v1049_v7 = vld [vmem:[#allocation8 + $0x250] sm:$0xff] }
 0x14d   :  { %v1736_v11 = vpack.c.bf16 %v1049_v7, %v1047_v6  ;;  %v1087_v6 = vld [vmem:[#allocation8 + $0x380] sm:$0xff]  ;;  %v1089_v7 = vld [vmem:[#allocation8 + $0x390] sm:$0xff] }
 0x14f   :  { %1649 = vmatpush1.bf16.msra.mxu1 %v1648_v13  ;;  %v1051_v13 = vld [vmem:[#allocation8 + $0x260] sm:$0xff] }
 0x150   :  { %1651 = vmatprep.subr.bf16.mxu1 %v1650_v15  ;;  %v1053_v15 = vld [vmem:[#allocation8 + $0x270] sm:$0xff] }
 0x151   :  { %v1740_v22 = vpack.c.bf16 %v1053_v15, %v1051_v13  ;;  %v1091_v13 = vld [vmem:[#allocation8 + $0x3a0] sm:$0xff]  ;;  %v1093_v15 = vld [vmem:[#allocation8 + $0x3b0] sm:$0xff] }
 0x153   :  { %1653 = vmatpush1.bf16.msra.mxu1 %v1652_v24  ;;  %v1055_v24 = vld [vmem:[#allocation8 + $0x280] sm:$0xff] }
 0x154   :  { %1655 = vmatprep.subr.bf16.mxu1 %v1654_v25  ;;  %v1057_v25 = vld [vmem:[#allocation8 + $0x290] sm:$0xff] }
 0x155   :  { %v1744_v28 = vpack.c.bf16 %v1057_v25, %v1055_v24  ;;  %v1095_v24 = vld [vmem:[#allocation8 + $0x3c0] sm:$0xff]  ;;  %v1097_v25 = vld [vmem:[#allocation8 + $0x3d0] sm:$0xff] }
 0x157   :  { %1657 = vmatpush1.bf16.msra.mxu1 %v1656_v30  ;;  %v1059_v30 = vld [vmem:[#allocation8 + $0x2a0] sm:$0xff] }
 0x158   :  { %1659 = vmatprep.subr.bf16.mxu1 %v1658_v31  ;;  %v1061_v31 = vld [vmem:[#allocation8 + $0x2b0] sm:$0xff] }
 0x15b   :  { %1661 = vmatpush1.bf16.msra.mxu1 %v1660_v34  ;;  %v1748_v34 = vpack.c.bf16 %v1061_v31, %v1059_v30  ;;  %v1099_v30 = vld [vmem:[#allocation8 + $0x3e0] sm:$0xff]  ;;  %v1101_v31 = vld [vmem:[#allocation8 + $0x3f0] sm:$0xff] }
 0x15c   :  { %1314 = vmatprep.subr.msk.mxu1 %vm492_vm1, %v462_v35  ;;  %v1750_v35 = vpack.c.bf16 %v1066_v33, %v1064_v32  ;;  %v1788_v32 = vpack.c.bf16 %v1101_v31, %v1099_v30  ;;  %v475_v33 = vsub.s32 2, %v2154_v42 }
 0x15f   :  { %1315 = vmatpush1.msk.msra.mxu1 %vm492_vm1, %v461_v36  ;;  %v1063_v36 = vld [vmem:[#allocation8 + $0x2c0] sm:$0xff] }
 0x160   :  { %955 = vmatmul.mubr.f32.vlgmr.msra.gmra.mrb[4].mxu1 %v2128_v41  ;;  %v468_v41 = vrot.slane %v2159_v45, %v2157_v44 }
 0x161   :  { %1317 = vmatprep.mubr.msk.f32.mxu1 %vm485_vm0, %v2130_v43  ;;  %v472_v43 = vrot.slane %v2159_v45, %v2162_v18 }
 0x164   :  { %961 = vmatmul.mubr.f32.gmra.mrb[6].mxu1 %v2136_v50 }
 0x185   :  { %v571_v37 = vpop.f32.mrb[0].mxu1 }
 0x186   :  { %v573_v38 = vpop.f32.mrb[1].mxu1  ;;  %v572_v50 = vadd.f32 %v571_v37, %v468_v41  ;;  %v1065_v37 = vld [vmem:[#allocation8 + $0x2d0] sm:$0xff] }
 0x187   :  { %v574_v17 = vadd.f32 %v573_v38, %v472_v43  ;;  %v1068_v38 = vld [vmem:[#allocation8 + $0x2e8] sm:$0xff] }
 0x189   :  { %v577_v16 = vpop.f32.mrb[2].mxu1 }
 0x18a   :  { %v579_v39 = vpop.f32.mrb[3].mxu1  ;;  %v578_v49 = vadd.f32 %v577_v16, %v468_v41  ;;  %v1070_v16 = vld [vmem:[#allocation8 + $0x2f8] sm:$0xff]  ;;  %v1067_v41 = vld [vmem:[#allocation8 + $0x2e0] sm:$0xff] }
 0x18b   :  { %v580_v54 = vadd.f32 %v579_v39, %v472_v43  ;;  %v1752_v39 = vpack.c.bf16 %v1065_v37, %v1063_v36  ;;  %v1754_v40 = vpack.c.bf16 %v1070_v16, %v1068_v38  ;;  %v1069_v43 = vld [vmem:[#allocation8 + $0x2f0] sm:$0xff] }
 0x1b5   :  { %v725_v46 = vpop.f32.mrb[0].mxu0 }
 0x1b6   :  { %v1791_v47 = vadd.f32 %v725_v46, %v572_v50  ;;  %v727_v48 = vpop.f32.mrb[1].mxu0  ;;  %v1072_v50 = vld [vmem:[#allocation8 + $0x308] sm:$0xff]  ;;  %v1756_v46 = vpack.c.bf16 %v1069_v43, %v1067_v41 }
 0x1b7   :  { %v1793_v53 = vadd.f32 %v727_v48, %v574_v17  ;;  %v1074_v17 = vld [vmem:[#allocation8 + $0x318] sm:$0xff]  ;;  %v1071_v48 = vld [vmem:[#allocation8 + $0x300] sm:$0xff] }
 0x1b8   :  { %v967_v58 = vmax.f32 %v1791_v47, 0.0  ;;  %v1758_v47 = vpack.c.bf16 %v1074_v17, %v1072_v50 }
 0x1b9   :  { %v968_v56 = vmax.f32 %v1793_v53, 0.0  ;;  %v731_v14 = vpop.f32.mrb[2].mxu0 }
 0x1ba   :  { %v1795_v59 = vadd.f32 %v731_v14, %v578_v49  ;;  %v733_v19 = vpop.f32.mrb[3].mxu0  ;;  %v1073_v49 = vld [vmem:[#allocation8 + $0x310] sm:$0xff]  ;;  %v1082_v14 = vld [vmem:[#allocation8 + $0x358] sm:$0xff] }
 0x1bb   :  { %1179 = vmatprep.mubr.f32.mxu0 %v968_v56  ;;  %v1797_v63 = vadd.f32 %v733_v19, %v580_v54  ;;  %v1760_v53 = vpack.c.bf16 %v1073_v49, %v1071_v48  ;;  %v1762_v54 = vpack.c.bf16 %v1078_v52, %v1076_v9  ;;  %v1080_v56 = vld [vmem:[#allocation8 + $0x348] sm:$0xff]  ;;  %v1081_v19 = vld [vmem:[#allocation8 + $0x350] sm:$0xff]  ;;  %v1273_v9 = vld [vmem:[#allocation11] sm:$0x3] }
 0x1bc   :  { %1180 = vmatmul.mubr.f32.vlgmr.msra.gmra.mrb[4].mxu0 %v967_v58  ;;  %v971_v2 = vmax.f32 %v1795_v59, 0.0  ;;  %v1766_v58 = vpack.c.bf16 %v1082_v14, %v1080_v56  ;;  %v1079_v59 = vld [vmem:[#allocation8 + $0x340] sm:$0xff]  ;;  %v1282_v56 = vrot.slane %v1273_v9, %v2162_v18 }
 0x1bd   :  { %v972_v3 = vmax.f32 %v1797_v63, 0.0  ;;  %1729 = vmatpush1.bf16.msra.mxu0 %v1728_v57  ;;  %v1764_v57 = vpack.c.bf16 %v1077_v55, %v1075_v51  ;;  %v1768_v62 = vpack.c.bf16 %v1081_v19, %v1079_v59  ;;  %v1278_v51 = vrot.slane %v1273_v9, %v2157_v44 }
 0x1be   :  { %1731 = vmatprep.subr.bf16.mxu0 %v1730_v60  ;;  %v1084_v60 = vld [vmem:[#allocation8 + $0x368] sm:$0xff] }
 0x1bf   :  { %1185 = vmatprep.mubr.f32.mxu0 %v972_v3  ;;  %v1770_v63 = vpack.c.bf16 %v1086_v61, %v1084_v60  ;;  %v1090_v3 = vld [vmem:[#allocation8 + $0x398] sm:$0xff] }
 0x1c0   :  { %1186 = vmatmul.mubr.f32.gmra.mrb[6].mxu0 %v971_v2  ;;  %v1088_v2 = vld [vmem:[#allocation8 + $0x388] sm:$0xff] }
 0x1c1   :  { %1733 = vmatpush1.bf16.msra.mxu0 %v1732_v4  ;;  %v1772_v4 = vpack.c.bf16 %v1085_v1, %v1083_v0 }
 0x1c2   :  { %1735 = vmatprep.subr.bf16.mxu0 %v1734_v5  ;;  %v1774_v5 = vpack.c.bf16 %v1090_v3, %v1088_v2 }
 0x1c5   :  { %1737 = vmatpush1.bf16.msra.mxu0 %v1736_v11  ;;  %v1776_v11 = vpack.c.bf16 %v1089_v7, %v1087_v6 }
 0x1c6   :  { %1739 = vmatprep.subr.bf16.mxu0 %v1738_v12  ;;  %v1778_v12 = vpack.c.bf16 %v1094_v10, %v1092_v8 }
 0x1c9   :  { %1741 = vmatpush1.bf16.msra.mxu0 %v1740_v22  ;;  %v1780_v22 = vpack.c.bf16 %v1093_v15, %v1091_v13 }
 0x1ca   :  { %1743 = vmatprep.subr.bf16.mxu0 %v1742_v23  ;;  %v1782_v23 = vpack.c.bf16 %v1098_v21, %v1096_v20 }
 0x1cd   :  { %1745 = vmatpush1.bf16.msra.mxu0 %v1744_v28  ;;  %v1784_v28 = vpack.c.bf16 %v1097_v25, %v1095_v24 }
 0x1ce   :  { %1747 = vmatprep.subr.bf16.mxu0 %v1746_v29  ;;  %v1786_v29 = vpack.c.bf16 %v1102_v27, %v1100_v26 }
 0x1d1   :  { %1749 = vmatpush1.bf16.msra.mxu0 %v1748_v34  ;;  %v479_v34 = vsub.s32 3, %v2154_v42  ;;  %v1103_v42 = vld [vmem:[#allocation10] sm:$0x3] }
 0x1d2   :  { %1751 = vmatprep.subr.bf16.mxu0 %v1750_v35  ;;  %v476_v35 = vrot.slane %v2159_v45, %v475_v33  ;;  %v1108_v49 = vrot.slane %v1103_v42, %v2157_v44  ;;  %v1296_v44 = vstv %s2191_s6 }
 0x1d3   :  { %v480_v36 = vrot.slane %v2159_v45, %v479_v34  ;;  %v1112_v45 = vrot.slane %v1103_v42, %v2162_v18 }
 0x1d5   :  { %1753 = vmatpush1.bf16.msra.mxu0 %v1752_v39 }
 0x1d6   :  { %1755 = vmatprep.subr.bf16.mxu0 %v1754_v40 }
 0x1d9   :  { %1757 = vmatpush1.bf16.msra.mxu0 %v1756_v46 }
 0x1da   :  { %1759 = vmatprep.subr.bf16.mxu0 %v1758_v47 }
 0x1dd   :  { %1761 = vmatpush1.bf16.msra.mxu0 %v1760_v53 }
 0x1de   :  { %1763 = vmatprep.subr.bf16.mxu0 %v1762_v54 }
 0x1e1   :  { %1765 = vmatpush1.bf16.msra.mxu0 %v1764_v57 }
 0x1e2   :  { %1767 = vmatprep.subr.bf16.mxu0 %v1766_v58 }
 0x1e5   :  { %1769 = vmatpush1.bf16.msra.mxu0 %v1768_v62 }
 0x1e6   :  { %1771 = vmatprep.subr.bf16.mxu0 %v1770_v63 }
 0x1e9   :  { %1773 = vmatpush1.bf16.msra.mxu0 %v1772_v4 }
 0x1ea   :  { %1775 = vmatprep.subr.bf16.mxu0 %v1774_v5 }
 0x1ed   :  { %1777 = vmatpush1.bf16.msra.mxu0 %v1776_v11 }
 0x1ee   :  { %1779 = vmatprep.subr.bf16.mxu0 %v1778_v12 }
 0x1f1   :  { %1781 = vmatpush1.bf16.msra.mxu0 %v1780_v22 }
 0x1f2   :  { %1783 = vmatprep.subr.bf16.mxu0 %v1782_v23 }
 0x1f5   :  { %1785 = vmatpush1.bf16.msra.mxu0 %v1784_v28 }
 0x1f6   :  { %1787 = vmatprep.subr.bf16.mxu0 %v1786_v29 }
 0x1f9   :  { %1789 = vmatpush1.bf16.msra.mxu0 %v1788_v32 }
 0x233   :  { %v956_v37 = vpop.f32.mrb[4].mxu1 }
 0x234   :  { %v1798_v38 = vadd.f32 %v956_v37, %v476_v35  ;;  %v958_v16 = vpop.f32.mrb[5].mxu1 }
 0x235   :  { %v1799_v39 = vadd.f32 %v958_v16, %v480_v36 }
 0x236   :  { %v969_v43 = vmax.f32 %v1798_v38, 0.0 }
 0x237   :  { %v970_v40 = vmax.f32 %v1799_v39, 0.0  ;;  %v962_v41 = vpop.f32.mrb[6].mxu1 }
 0x238   :  { %v1800_v50 = vadd.f32 %v962_v41, %v476_v35  ;;  %v964_v17 = vpop.f32.mrb[7].mxu1 }
 0x239   :  { %v1801_v46 = vadd.f32 %v964_v17, %v480_v36  ;;  %1256 = vmatprep.mubr.f32.mxu0 %v970_v40 }
 0x23a   :  { %1257 = vmatmul.mubr.f32.vlgmr.msra.gmra.mrb[4].mxu0 %v969_v43  ;;  %v973_v48 = vmax.f32 %v1800_v50, 0.0 }
 0x23b   :  { %v974_v47 = vmax.f32 %v1801_v46, 0.0 }
 0x23d   :  { %1262 = vmatprep.mubr.f32.mxu0 %v974_v47 }
 0x23e   :  { %1263 = vmatmul.mubr.f32.gmra.mrb[6].mxu0 %v973_v48 }
 0x30d   :  { %v1258_v52 = vpop.f32.mrb[4].mxu0 }
 0x30e   :  { %v1802_v53 = vadd.f32 %v1258_v52, %v1108_v49  ;;  %v1260_v54 = vpop.f32.mrb[5].mxu0 }
 0x30f   :  { %v1803_v55 = vadd.f32 %v1260_v54, %v1112_v45 }
 0x310   :  { %v1269_v14 = vmax.f32 %v1802_v53, 0.0 }
 0x311   :  { %v1270_v57 = vmax.f32 %v1803_v55, 0.0  ;;  %v1264_v58 = vpop.f32.mrb[6].mxu0 }
 0x312   :  { %v1804_v59 = vadd.f32 %v1264_v58, %v1108_v49  ;;  %v1266_v19 = vpop.f32.mrb[7].mxu0  ;;  %v1285_v60 = vmul.f32 %v1278_v51, %v1269_v14 }
 0x313   :  { %v1805_v61 = vadd.f32 %v1266_v19, %v1112_v45  ;;  %v1286_v62 = vmul.f32 %v1282_v56, %v1270_v57 }
 0x314   :  { %v1271_v63 = vmax.f32 %v1804_v59, 0.0 }
 0x315   :  { %v1272_v0 = vmax.f32 %v1805_v61, 0.0  ;;  %v1289_v1 = vadd.f32 %v1286_v62, %v1285_v60 }
 0x316   :  { %v1287_v2 = vmul.f32 %v1278_v51, %v1271_v63 }
 0x317   :  { %v1288_v3 = vmul.f32 %v1282_v56, %v1272_v0  ;;  %1290 = vadd.xlane.f32.xlu0 %v1289_v1 }
 0x319   :  { %v1292_v4 = vadd.f32 %v1288_v3, %v1287_v2 }
 0x31b   :  { %1293 = vadd.xlane.f32.xlu0 %v1292_v4 }
 0x3a4   :  { %v1291_v18 = vpop.xlane.xlu0 %1290 }
 0x3a5   :  { %v1297_v5 = vadd.f32 %v1296_v44, %v1291_v18 }
 0x3a7   :  { %1300 = vst.msk [vmem:[%s2192_s7] sm:$0xff] %vm1299_vm2, %v1297_v5 }
 0x3a8   :  { %v1294_v6 = vpop.xlane.xlu0 %1293 }
 0x3a9   :  { %v1298_v7 = vadd.f32 %v1296_v44, %v1294_v6 }
 0x3ab   :  { %1301 = vst.msk [vmem:[%s2192_s7 + $0x8] sm:$0xff] %vm1299_vm2, %v1298_v7 }
 0x3ac   :  { %1306 = vsyncpa [#allocation4], 1 }
 0x3ad   :  { %1307 = vsyncpa [#allocation6], 1 }
 0x3ae   :  { %1308 = vsyncpa [#allocation9], 1 }
 0x3af   :  { %1309 = vsyncpa [#allocation12], 1 }

</bundles_post_ra>
